<compile_context>
chip_gen: v5e
topology: v5e:2x2
jax: 0.10.0
libtpu: 0.0.40
codegen_flags: <defaults>
</compile_context>

<pallas_src>
import numpy as np
import jax
import jax.numpy as jnp
from jax.experimental import pallas as pl
from jax.experimental.pallas import tpu as pltpu

# ---------------- model constants (derived from the PyTorch module) ----------
CHUNK = 21                      # input_feature_chunk_size
ORIG_FEAT = 187                 # input_original_feature_size
SEQ_LEN = 9                     # ceil(187 / 21)
PADDING = 2                     # 21 - 187 % 21
GROUP_W = 64                    # per-sample lane width: [fwd 32 | bwd 32]
PAD_H = 32                      # padded hidden width per direction
NUM_CLASSES = 1
LANE_GROUPS = 2                 # batch groups packed along lanes (128 MXU cols)
MAX_ROWS = 256                  # max batch rows per grid block (MXU row fill)

# (real_input_size, hidden_size, num_layers) for rnn_block_0..3
BLOCKS = [(CHUNK, 32, 3), (64, 16, 4), (32, 16, 4), (32, 16, 4)]
N_LAYERS = sum(nl for _, _, nl in BLOCKS)            # 15 bidirectional layers
HEAD_IN_REAL = SEQ_LEN * 2 * 16                      # 288
HEAD_HIDDEN = 64


# ------------------------------ Pallas kernel ---------------------------------
def rnn_ptb_kernel(x_ref, wih_ref, whh_ref, b_ref,
                   w1_ref, b1_ref, w2_ref, b2_ref,
                   out_ref, seq_ref, steps_ref):
    T, Bb, L = x_ref.shape             # (9, batch_rows, 64*LANE_GROUPS)

    # forward lanes are [g*64, g*64+32) of every 64-lane group
    lane = jax.lax.broadcasted_iota(jnp.int32, (Bb, L), 1)
    fwd_mask = (lane % GROUP_W) < PAD_H

    seq_ref[...] = x_ref[...]          # resident (T, Bb, L) sequence slab

    @pl.loop(0, N_LAYERS)
    def _layer(l):
        w_ih = wih_ref[l]              # (L, L) bf16, fwd/bwd cols packed per group
        w_hh = whh_ref[l]              # (L, L) bf16, block-diagonal
        bias = b_ref[l]                # (1, L) f32, b_ih + b_hh

        # ---- input projection hoisted out of the recurrence (one MXU dot) ----
        seq = seq_ref[...]                                         # (T, Bb, L)
        xp = jnp.dot(seq.reshape(T * Bb, L).astype(jnp.bfloat16), w_ih,
                     preferred_element_type=jnp.float32) + bias    # (T*Bb, L)
        xp = xp.reshape(T, Bb, L)

        # ---- fused bidirectional ReLU recurrence (T dependent matmuls) -------
        # step s: fwd half consumes time s, bwd half consumes time T-1-s
        h = jnp.zeros((Bb, L), jnp.bfloat16)
        for s in range(T):                                         # unrolled
            xs = jnp.where(fwd_mask, xp[s], xp[T - 1 - s])         # whole-tile sel
            pre = xs + jnp.dot(h, w_hh, preferred_element_type=jnp.float32)
            hf = jnp.maximum(pre, 0.0)                             # relu in f32
            steps_ref[s] = hf
            h = hf.astype(jnp.bfloat16)                            # next MXU operand

        # ---- de-align back to true time order (no concats, no lane slices) ---
        for t in range(T):                                         # unrolled
            seq_ref[t] = jnp.where(fwd_mask, steps_ref[t], steps_ref[T - 1 - t])

    # ---- head: Flatten -> Linear(288,64) -> ReLU -> Linear(64,1) -> Sigmoid --
    acc = jnp.zeros((Bb, L), jnp.float32)
    for t in range(T):
        acc = acc + jnp.dot(seq_ref[t], w1_ref[t],
                            preferred_element_type=jnp.float32)
    hid = jnp.maximum(acc + b1_ref[...], 0.0)
    logits = jnp.dot(hid, w2_ref[...],
                     preferred_element_type=jnp.float32) + b2_ref[...]
    out_ref[...] = jax.nn.sigmoid(logits)


# ---------------------------- parameter packing --------------------------------
def init_params(key, lane_groups=LANE_GROUPS):
    """PyTorch-style init; returns (raw weights for the reference, packed)."""
    keys = iter(jax.random.split(key, 8 * N_LAYERS + 4))

    def u(shape, bound):
        return np.asarray(jax.random.uniform(next(keys), shape,
                                             minval=-bound, maxval=bound),
                          np.float32)

    raw_layers = []
    wih = np.zeros((N_LAYERS, GROUP_W, GROUP_W), np.float32)
    whh = np.zeros((N_LAYERS, GROUP_W, GROUP_W), np.float32)
    bias = np.zeros((N_LAYERS, 1, GROUP_W), np.float32)

    idx = 0
    for bi, (in_size, H, n_layers) in enumerate(BLOCKS):
        k = 1.0 / np.sqrt(H)
        for layer in range(n_layers):
            real_in = in_size if layer == 0 else 2 * H
            per_dir = []
            for d in range(2):                       # 0 = forward, 1 = backward
                col0 = 0 if d == 0 else PAD_H
                W_ih = u((H, real_in), k)
                W_hh = u((H, H), k)
                b_ih = u((H,), k)
                b_hh = u((H,), k)
                per_dir.append((W_ih, W_hh, b_ih, b_hh))
                W_ih_T = W_ih.T                      # (real_in, H)
                if idx == 0:
                    # raw chunk input lives at lanes [0:21]
                    wih[idx, :real_in, col0:col0 + H] = W_ih_T
                else:
                    # input is bidirectional: fwd at [0:Hp], bwd at [32:32+Hp]
                    Hp = real_in // 2
                    wih[idx, :Hp, col0:col0 + H] = W_ih_T[:Hp]
                    wih[idx, PAD_H:PAD_H + Hp, col0:col0 + H] = W_ih_T[Hp:]
                whh[idx, col0:col0 + H, col0:col0 + H] = W_hh.T
                bias[idx, 0, col0:col0 + H] = b_ih + b_hh
            raw_layers.append(per_dir)
            idx += 1

    # classification head
    k1 = 1.0 / np.sqrt(HEAD_IN_REAL)
    W1 = u((HEAD_HIDDEN, HEAD_IN_REAL), k1)
    b1 = u((HEAD_HIDDEN,), k1)
    k2 = 1.0 / np.sqrt(HEAD_HIDDEN)
    W2 = u((NUM_CLASSES, HEAD_HIDDEN), k2)
    b2 = u((NUM_CLASSES,), k2)

    H_last = 16
    W1T = W1.T                                       # (288, 64), per-t [fwd16|bwd16]
    w1p = np.zeros((SEQ_LEN, GROUP_W, HEAD_HIDDEN), np.float32)
    for t in range(SEQ_LEN):
        r0 = t * 2 * H_last
        w1p[t, :H_last, :] = W1T[r0:r0 + H_last]
        w1p[t, PAD_H:PAD_H + H_last, :] = W1T[r0 + H_last:r0 + 2 * H_last]

    # ---- widen to `lane_groups` independent batch groups along the lanes ----
    G = lane_groups

    def bdiag(w):                                    # (N, a, b) -> (N, G*a, G*b)
        n, a, b = w.shape
        out = np.zeros((n, G * a, G * b), np.float32)
        for g in range(G):
            out[:, g * a:(g + 1) * a, g * b:(g + 1) * b] = w
        return out

    wih_g = bdiag(wih)
    whh_g = bdiag(whh)
    w1_g = bdiag(w1p)
    bias_g = np.tile(bias, (1, 1, G))
    b1_g = np.tile(b1.reshape(1, HEAD_HIDDEN), (1, G))
    w2_g = np.zeros((G * HEAD_HIDDEN, G * NUM_CLASSES), np.float32)
    for g in range(G):
        w2_g[g * HEAD_HIDDEN:(g + 1) * HEAD_HIDDEN,
             g * NUM_CLASSES:(g + 1) * NUM_CLASSES] = W2.T
    b2_g = np.tile(b2.reshape(1, NUM_CLASSES), (1, G))

    packed = (jnp.asarray(wih_g, jnp.bfloat16),      # bf16 MXU operands
              jnp.asarray(whh_g, jnp.bfloat16),
              jnp.asarray(bias_g, jnp.float32),
              jnp.asarray(w1_g, jnp.float32),
              jnp.asarray(b1_g, jnp.float32),
              jnp.asarray(w2_g, jnp.float32),
              jnp.asarray(b2_g, jnp.float32))
    raw = dict(layers=raw_layers, W1=W1, b1=b1, W2=W2, b2=b2)
    return raw, packed


# --------------------------------- wrapper -------------------------------------
def adjust_input(x, b_pad):
    """RnnModelMITBIH.adjust_input, laid out time-major (T, b_pad, 64)."""
    B = x.shape[0]
    out = jnp.transpose(x, (0, 2, 1))                                 # (B,187,1)
    out = jnp.concatenate(
        [out, jnp.zeros((B, PADDING, out.shape[2]), out.dtype)], axis=1)
    out = out.reshape(B, SEQ_LEN, CHUNK)                              # (B, 9, 21)
    out = jnp.transpose(out, (1, 0, 2))                               # (9, B, 21)
    out = jnp.pad(out, ((0, 0), (0, b_pad - B), (0, GROUP_W - CHUNK)))
    return out.astype(jnp.float32)


def rnn_model_ptb_forward(x, packed, lane_groups=LANE_GROUPS):
    B = x.shape[0]
    G = lane_groups
    L = G * GROUP_W

    # batch rows per grid block: multiple of 8 (f32 sublane tile), grow up to
    # MAX_ROWS to fill MXU rows; extra batch becomes more ("parallel") blocks.
    rows = -(-B // G)
    b_rows = min(MAX_ROWS, ((max(rows, 1) + 7) // 8) * 8)
    n_blk = -(-B // (G * b_rows))
    b_pad = n_blk * G * b_rows

    x_adj = adjust_input(x, b_pad)                                    # (T,b_pad,64)
    # lane-pack G batch groups side by side:
    # sample blk*G*b_rows + g*b_rows + r  ->  row blk*b_rows + r, lanes [g*64,(g+1)*64)
    xg = x_adj.reshape(SEQ_LEN, n_blk, G, b_rows, GROUP_W)
    xg = jnp.transpose(xg, (0, 1, 3, 2, 4)).reshape(SEQ_LEN, n_blk * b_rows, L)

    wih, whh, bias, w1p, b1p, w2p, b2p = packed

    def full_spec(a):
        nd = a.ndim
        return pl.BlockSpec(a.shape, lambda i, nd=nd: (0,) * nd)

    out = pl.pallas_call(
        rnn_ptb_kernel,
        out_shape=jax.ShapeDtypeStruct((n_blk * b_rows, G * NUM_CLASSES),
                                       jnp.float32),
        grid=(n_blk,),
        in_specs=[pl.BlockSpec((SEQ_LEN, b_rows, L), lambda i: (0, i, 0)),
                  full_spec(wih), full_spec(whh), full_spec(bias),
                  full_spec(w1p), full_spec(b1p), full_spec(w2p),
                  full_spec(b2p)],
        out_specs=pl.BlockSpec((b_rows, G * NUM_CLASSES), lambda i: (i, 0)),
        scratch_shapes=[pltpu.VMEM((SEQ_LEN, b_rows, L), jnp.float32),   # seq slab
                        pltpu.VMEM((SEQ_LEN, b_rows, L), jnp.float32)],  # step outs
        compiler_params=pltpu.CompilerParams(
            dimension_semantics=("parallel",),       # v7x: split batch over 2 TCs
            vmem_limit_bytes=32 * 1024 * 1024),
    )(xg, wih, whh, bias, w1p, b1p, w2p, b2p)

    # un-pack lane groups back to sample order, drop batch padding
    out = out.reshape(n_blk, b_rows, G)
    out = jnp.transpose(out, (0, 2, 1)).reshape(b_pad)
    # reshape_output().squeeze(); sigmoid already applied in-kernel
    return jnp.squeeze(out[:B])


# ------------------------- pure-JAX f32 reference ------------------------------
def reference_forward(x, raw):
    B = x.shape[0]
    out = jnp.transpose(x, (0, 2, 1))
    out = jnp.concatenate(
        [out, jnp.zeros((B, PADDING, out.shape[2]), out.dtype)], axis=1)
    seq = out.reshape(B, SEQ_LEN, CHUNK)                              # (B, T, 21)
    for fwd_w, bwd_w in raw["layers"]:
        Wif, Whf, bif, bhf = fwd_w
        Wib, Whb, bib, bhb = bwd_w
        H = Wif.shape[0]
        hf = jnp.zeros((B, H), jnp.float32)
        f_out = []
        for t in range(SEQ_LEN):
            hf = jax.nn.relu(seq[:, t] @ Wif.T + bif + hf @ Whf.T + bhf)
            f_out.append(hf)
        hb = jnp.zeros((B, H), jnp.float32)
        b_out = [None] * SEQ_LEN
        for t in range(SEQ_LEN - 1, -1, -1):
            hb = jax.nn.relu(seq[:, t] @ Wib.T + bib + hb @ Whb.T + bhb)
            b_out[t] = hb
        seq = jnp.stack([jnp.concatenate([f_out[t], b_out[t]], axis=-1)
                         for t in range(SEQ_LEN)], axis=1)
    flat = seq.reshape(B, -1)
    hid = jax.nn.relu(flat @ raw["W1"].T + raw["b1"])
    logits = hid @ raw["W2"].T + raw["b2"]
    return jnp.squeeze(jax.nn.sigmoid(logits))


# ----------------------------------- main ---------------------------------------
if __name__ == "__main__":
    key = jax.random.PRNGKey(0)
    pkey, xkey = jax.random.split(key)
    raw, packed = init_params(pkey)

    # PyTorch-style NCL input: (batch=2, channels=1, length=187)
    x = jax.random.normal(xkey, (2, 1, ORIG_FEAT), dtype=jnp.float32)

    y = rnn_model_ptb_forward(x, packed)
    y = jax.block_until_ready(y)
    assert y.shape == (2,)
    assert bool(jnp.all((y >= 0.0) & (y <= 1.0)))

    # validate the bf16 MXU kernel against the pure-JAX f32 reference
    y_ref = reference_forward(x, raw)
    err = float(jnp.max(jnp.abs(y - y_ref)))
    assert err < 4e-2, f"kernel deviates from f32 reference by {err}"

    print("KERNEL_OK")
</pallas_src>

<mosaic_0001>
module attributes {stable_mosaic.version = 11 : i64} {
  func.func @rnn_ptb_kernel(%arg0: i32, %arg1: memref<9x8x128xf32, #tpu.memory_space<vmem>>, %arg2: memref<15x128x128xbf16, #tpu.memory_space<vmem>>, %arg3: memref<15x128x128xbf16, #tpu.memory_space<vmem>>, %arg4: memref<15x1x128xf32, #tpu.memory_space<vmem>>, %arg5: memref<9x128x128xf32, #tpu.memory_space<vmem>>, %arg6: memref<1x128xf32, #tpu.memory_space<vmem>>, %arg7: memref<128x2xf32, #tpu.memory_space<vmem>>, %arg8: memref<1x2xf32, #tpu.memory_space<vmem>>, %arg9: memref<8x2xf32, #tpu.memory_space<vmem>>, %arg10: memref<9x8x128xf32, #tpu.memory_space<vmem>>, %arg11: memref<9x8x128xf32, #tpu.memory_space<vmem>>) attributes {dimension_semantics = [#tpu.dimension_semantics<parallel>], iteration_bounds = array<i64: 1>, scalar_prefetch = 0 : i64, scratch_operands = 2 : i64, tpu.core_type = #tpu.core_type<tc>, window_params = [{transform_indices = @transform_0, window_bounds = array<i64: 9, 8, 128>}, {pipeline_mode = #tpu.pipeline_mode<synchronous>, transform_indices = @transform_1, window_bounds = array<i64: 15, 128, 128>}, {pipeline_mode = #tpu.pipeline_mode<synchronous>, transform_indices = @transform_2, window_bounds = array<i64: 15, 128, 128>}, {pipeline_mode = #tpu.pipeline_mode<synchronous>, transform_indices = @transform_3, window_bounds = array<i64: 15, 1, 128>}, {pipeline_mode = #tpu.pipeline_mode<synchronous>, transform_indices = @transform_4, window_bounds = array<i64: 9, 128, 128>}, {pipeline_mode = #tpu.pipeline_mode<synchronous>, transform_indices = @transform_5, window_bounds = array<i64: 1, 128>}, {pipeline_mode = #tpu.pipeline_mode<synchronous>, transform_indices = @transform_6, window_bounds = array<i64: 128, 2>}, {pipeline_mode = #tpu.pipeline_mode<synchronous>, transform_indices = @transform_7, window_bounds = array<i64: 1, 2>}, {transform_indices = @transform_8, window_bounds = array<i64: 8, 2>}]} {
    %0 = tpu.iota {dimensions = array<i32: 1>} : vector<8x128xi32>
    %c64_i32 = arith.constant 64 : i32
    %c0_i32 = arith.constant 0 : i32
    %1 = arith.cmpi eq, %c64_i32, %c0_i32 : i32
    %c1_i32 = arith.constant 1 : i32
    %2 = arith.select %1, %c1_i32, %c64_i32 : i32
    %3 = vector.broadcast %2 : i32 to vector<8x128xi32>
    %4 = arith.remsi %0, %3 : vector<8x128xi32>
    %c0_i32_0 = arith.constant 0 : i32
    %5 = vector.broadcast %c0_i32_0 : i32 to vector<8x128xi32>
    %6 = arith.cmpi ne, %4, %5 : vector<8x128xi32>
    %c0_i32_1 = arith.constant 0 : i32
    %7 = vector.broadcast %c0_i32_1 : i32 to vector<8x128xi32>
    %8 = arith.cmpi slt, %4, %7 : vector<8x128xi32>
    %c0_i32_2 = arith.constant 0 : i32
    %9 = arith.cmpi slt, %2, %c0_i32_2 : i32
    %10 = vector.broadcast %9 : i1 to vector<8x128xi1>
    %11 = vector.broadcast %10 : vector<8x128xi1> to vector<8x128xi1>
    %12 = arith.xori %8, %11 : vector<8x128xi1>
    %13 = arith.andi %12, %6 : vector<8x128xi1>
    %14 = vector.broadcast %2 : i32 to vector<8x128xi32>
    %15 = arith.addi %4, %14 : vector<8x128xi32>
    %16 = arith.select %13, %15, %4 : vector<8x128xi1>, vector<8x128xi32>
    %c32_i32 = arith.constant 32 : i32
    %17 = vector.broadcast %c32_i32 : i32 to vector<8x128xi32>
    %18 = arith.cmpi slt, %16, %17 : vector<8x128xi32>
    %c0 = arith.constant 0 : index
    %c0_3 = arith.constant 0 : index
    %c0_4 = arith.constant 0 : index
    %19 = vector.load %arg1[%c0, %c0_3, %c0_4] : memref<9x8x128xf32, #tpu.memory_space<vmem>>, vector<9x8x128xf32>
    %c0_5 = arith.constant 0 : index
    %c0_6 = arith.constant 0 : index
    %c0_7 = arith.constant 0 : index
    %20 = vector.load %arg10[%c0_5, %c0_6, %c0_7] : memref<9x8x128xf32, #tpu.memory_space<vmem>>, vector<9x8x128xf32>
    tpu.vector_store %arg10[%c0_5, %c0_6, %c0_7], %19 {strides = array<i32>} : memref<9x8x128xf32, #tpu.memory_space<vmem>>, vector<9x8x128xf32>,
    %c0_i32_8 = arith.constant 0 : i32
    %c15_i32 = arith.constant 15 : i32
    %21 = arith.addi %c0_i32_8, %c15_i32 : i32
    %c1_i32_9 = arith.constant 1 : i32
    scf.for %arg12 = %c0_i32_8 to %21 step %c1_i32_9  : i32 {
      %c1_i32_77 = arith.constant 1 : i32
      %93 = arith.muli %arg12, %c1_i32_77 : i32
      %c0_i32_78 = arith.constant 0 : i32
      %94 = arith.addi %c0_i32_78, %93 : i32
      %95 = arith.index_cast %94 : i32 to index
      %c0_79 = arith.constant 0 : index
      %c0_80 = arith.constant 0 : index
      %96 = vector.load %arg2[%95, %c0_79, %c0_80] : memref<15x128x128xbf16, #tpu.memory_space<vmem>>, vector<1x128x128xbf16>
      %97 = vector.shape_cast %96 : vector<1x128x128xbf16> to vector<128x128xbf16>
      %98 = arith.index_cast %94 : i32 to index
      %c0_81 = arith.constant 0 : index
      %c0_82 = arith.constant 0 : index
      %99 = vector.load %arg3[%98, %c0_81, %c0_82] : memref<15x128x128xbf16, #tpu.memory_space<vmem>>, vector<1x128x128xbf16>
      %100 = vector.shape_cast %99 : vector<1x128x128xbf16> to vector<128x128xbf16>
      %101 = arith.index_cast %94 : i32 to index
      %c0_83 = arith.constant 0 : index
      %c0_84 = arith.constant 0 : index
      %102 = vector.load %arg4[%101, %c0_83, %c0_84] : memref<15x1x128xf32, #tpu.memory_space<vmem>>, vector<1x1x128xf32>
      %103 = vector.shape_cast %102 : vector<1x1x128xf32> to vector<1x128xf32>
      %c0_85 = arith.constant 0 : index
      %c0_86 = arith.constant 0 : index
      %c0_87 = arith.constant 0 : index
      %104 = vector.load %arg10[%c0_85, %c0_86, %c0_87] : memref<9x8x128xf32, #tpu.memory_space<vmem>>, vector<9x8x128xf32>
      %105 = vector.shape_cast %104 : vector<9x8x128xf32> to vector<72x128xf32>
      %106 = arith.truncf %105 : vector<72x128xf32> to vector<72x128xbf16>
      %cst_88 = arith.constant dense<0.000000e+00> : vector<72x128xf32>
      %107 = tpu.matmul %106, %97, %cst_88 {dimension_numbers = #tpu.dot_dimension_numbers<[1], [0], [0], [1], [0, 0, 1, 1], [], []>} : vector<72x128xbf16>, vector<128x128xbf16>, vector<72x128xf32> -> vector<72x128xf32>
      %108 = vector.broadcast %103 : vector<1x128xf32> to vector<72x128xf32>
      %109 = arith.addf %107, %108 : vector<72x128xf32>
      %110 = vector.shape_cast %109 : vector<72x128xf32> to vector<9x8x128xf32>
      %cst_89 = arith.constant 0.000000e+00 : bf16
      %111 = vector.broadcast %cst_89 : bf16 to vector<8x128xbf16>
      %112 = vector.extract_strided_slice %110 {offsets = [0, 0, 0], sizes = [1, 8, 128], strides = [1, 1, 1]} : vector<9x8x128xf32> to vector<1x8x128xf32>
      %113 = vector.shape_cast %112 : vector<1x8x128xf32> to vector<8x128xf32>
      %114 = vector.extract_strided_slice %110 {offsets = [8, 0, 0], sizes = [1, 8, 128], strides = [1, 1, 1]} : vector<9x8x128xf32> to vector<1x8x128xf32>
      %115 = vector.shape_cast %114 : vector<1x8x128xf32> to vector<8x128xf32>
      %116 = arith.select %18, %113, %115 : vector<8x128xi1>, vector<8x128xf32>
      %cst_90 = arith.constant dense<0.000000e+00> : vector<8x128xf32>
      %117 = tpu.matmul %111, %100, %cst_90 {dimension_numbers = #tpu.dot_dimension_numbers<[1], [0], [0], [1], [0, 0, 1, 1], [], []>} : vector<8x128xbf16>, vector<128x128xbf16>, vector<8x128xf32> -> vector<8x128xf32>
      %118 = arith.addf %116, %117 : vector<8x128xf32>
      %cst_91 = arith.constant 0.000000e+00 : f32
      %119 = vector.broadcast %cst_91 : f32 to vector<8x128xf32>
      %120 = arith.maximumf %118, %119 : vector<8x128xf32>
      %c0_92 = arith.constant 0 : index
      %c0_93 = arith.constant 0 : index
      %c0_94 = arith.constant 0 : index
      %121 = vector.load %arg11[%c0_92, %c0_93, %c0_94] : memref<9x8x128xf32, #tpu.memory_space<vmem>>, vector<1x8x128xf32>
      %122 = vector.shape_cast %121 : vector<1x8x128xf32> to vector<8x128xf32>
      %123 = vector.shape_cast %120 : vector<8x128xf32> to vector<1x8x128xf32>
      tpu.vector_store %arg11[%c0_92, %c0_93, %c0_94], %123 {strides = array<i32>} : memref<9x8x128xf32, #tpu.memory_space<vmem>>, vector<1x8x128xf32>,
      %124 = arith.truncf %120 : vector<8x128xf32> to vector<8x128xbf16>
      %125 = vector.extract_strided_slice %110 {offsets = [1, 0, 0], sizes = [1, 8, 128], strides = [1, 1, 1]} : vector<9x8x128xf32> to vector<1x8x128xf32>
      %126 = vector.shape_cast %125 : vector<1x8x128xf32> to vector<8x128xf32>
      %127 = vector.extract_strided_slice %110 {offsets = [7, 0, 0], sizes = [1, 8, 128], strides = [1, 1, 1]} : vector<9x8x128xf32> to vector<1x8x128xf32>
      %128 = vector.shape_cast %127 : vector<1x8x128xf32> to vector<8x128xf32>
      %129 = arith.select %18, %126, %128 : vector<8x128xi1>, vector<8x128xf32>
      %cst_95 = arith.constant dense<0.000000e+00> : vector<8x128xf32>
      %130 = tpu.matmul %124, %100, %cst_95 {dimension_numbers = #tpu.dot_dimension_numbers<[1], [0], [0], [1], [0, 0, 1, 1], [], []>} : vector<8x128xbf16>, vector<128x128xbf16>, vector<8x128xf32> -> vector<8x128xf32>
      %131 = arith.addf %129, %130 : vector<8x128xf32>
      %cst_96 = arith.constant 0.000000e+00 : f32
      %132 = vector.broadcast %cst_96 : f32 to vector<8x128xf32>
      %133 = arith.maximumf %131, %132 : vector<8x128xf32>
      %c1_97 = arith.constant 1 : index
      %c0_98 = arith.constant 0 : index
      %c0_99 = arith.constant 0 : index
      %134 = vector.load %arg11[%c1_97, %c0_98, %c0_99] : memref<9x8x128xf32, #tpu.memory_space<vmem>>, vector<1x8x128xf32>
      %135 = vector.shape_cast %134 : vector<1x8x128xf32> to vector<8x128xf32>
      %136 = vector.shape_cast %133 : vector<8x128xf32> to vector<1x8x128xf32>
      tpu.vector_store %arg11[%c1_97, %c0_98, %c0_99], %136 {strides = array<i32>} : memref<9x8x128xf32, #tpu.memory_space<vmem>>, vector<1x8x128xf32>,
      %137 = arith.truncf %133 : vector<8x128xf32> to vector<8x128xbf16>
      %138 = vector.extract_strided_slice %110 {offsets = [2, 0, 0], sizes = [1, 8, 128], strides = [1, 1, 1]} : vector<9x8x128xf32> to vector<1x8x128xf32>
      %139 = vector.shape_cast %138 : vector<1x8x128xf32> to vector<8x128xf32>
      %140 = vector.extract_strided_slice %110 {offsets = [6, 0, 0], sizes = [1, 8, 128], strides = [1, 1, 1]} : vector<9x8x128xf32> to vector<1x8x128xf32>
      %141 = vector.shape_cast %140 : vector<1x8x128xf32> to vector<8x128xf32>
      %142 = arith.select %18, %139, %141 : vector<8x128xi1>, vector<8x128xf32>
      %cst_100 = arith.constant dense<0.000000e+00> : vector<8x128xf32>
      %143 = tpu.matmul %137, %100, %cst_100 {dimension_numbers = #tpu.dot_dimension_numbers<[1], [0], [0], [1], [0, 0, 1, 1], [], []>} : vector<8x128xbf16>, vector<128x128xbf16>, vector<8x128xf32> -> vector<8x128xf32>
      %144 = arith.addf %142, %143 : vector<8x128xf32>
      %cst_101 = arith.constant 0.000000e+00 : f32
      %145 = vector.broadcast %cst_101 : f32 to vector<8x128xf32>
      %146 = arith.maximumf %144, %145 : vector<8x128xf32>
      %c2_102 = arith.constant 2 : index
      %c0_103 = arith.constant 0 : index
      %c0_104 = arith.constant 0 : index
      %147 = vector.load %arg11[%c2_102, %c0_103, %c0_104] : memref<9x8x128xf32, #tpu.memory_space<vmem>>, vector<1x8x128xf32>
      %148 = vector.shape_cast %147 : vector<1x8x128xf32> to vector<8x128xf32>
      %149 = vector.shape_cast %146 : vector<8x128xf32> to vector<1x8x128xf32>
      tpu.vector_store %arg11[%c2_102, %c0_103, %c0_104], %149 {strides = array<i32>} : memref<9x8x128xf32, #tpu.memory_space<vmem>>, vector<1x8x128xf32>,
      %150 = arith.truncf %146 : vector<8x128xf32> to vector<8x128xbf16>
      %151 = vector.extract_strided_slice %110 {offsets = [3, 0, 0], sizes = [1, 8, 128], strides = [1, 1, 1]} : vector<9x8x128xf32> to vector<1x8x128xf32>
      %152 = vector.shape_cast %151 : vector<1x8x128xf32> to vector<8x128xf32>
      %153 = vector.extract_strided_slice %110 {offsets = [5, 0, 0], sizes = [1, 8, 128], strides = [1, 1, 1]} : vector<9x8x128xf32> to vector<1x8x128xf32>
      %154 = vector.shape_cast %153 : vector<1x8x128xf32> to vector<8x128xf32>
      %155 = arith.select %18, %152, %154 : vector<8x128xi1>, vector<8x128xf32>
      %cst_105 = arith.constant dense<0.000000e+00> : vector<8x128xf32>
      %156 = tpu.matmul %150, %100, %cst_105 {dimension_numbers = #tpu.dot_dimension_numbers<[1], [0], [0], [1], [0, 0, 1, 1], [], []>} : vector<8x128xbf16>, vector<128x128xbf16>, vector<8x128xf32> -> vector<8x128xf32>
      %157 = arith.addf %155, %156 : vector<8x128xf32>
      %cst_106 = arith.constant 0.000000e+00 : f32
      %158 = vector.broadcast %cst_106 : f32 to vector<8x128xf32>
      %159 = arith.maximumf %157, %158 : vector<8x128xf32>
      %c3_107 = arith.constant 3 : index
      %c0_108 = arith.constant 0 : index
      %c0_109 = arith.constant 0 : index
      %160 = vector.load %arg11[%c3_107, %c0_108, %c0_109] : memref<9x8x128xf32, #tpu.memory_space<vmem>>, vector<1x8x128xf32>
      %161 = vector.shape_cast %160 : vector<1x8x128xf32> to vector<8x128xf32>
      %162 = vector.shape_cast %159 : vector<8x128xf32> to vector<1x8x128xf32>
      tpu.vector_store %arg11[%c3_107, %c0_108, %c0_109], %162 {strides = array<i32>} : memref<9x8x128xf32, #tpu.memory_space<vmem>>, vector<1x8x128xf32>,
      %163 = arith.truncf %159 : vector<8x128xf32> to vector<8x128xbf16>
      %164 = vector.extract_strided_slice %110 {offsets = [4, 0, 0], sizes = [1, 8, 128], strides = [1, 1, 1]} : vector<9x8x128xf32> to vector<1x8x128xf32>
      %165 = vector.shape_cast %164 : vector<1x8x128xf32> to vector<8x128xf32>
      %166 = vector.extract_strided_slice %110 {offsets = [4, 0, 0], sizes = [1, 8, 128], strides = [1, 1, 1]} : vector<9x8x128xf32> to vector<1x8x128xf32>
      %167 = vector.shape_cast %166 : vector<1x8x128xf32> to vector<8x128xf32>
      %168 = arith.select %18, %165, %167 : vector<8x128xi1>, vector<8x128xf32>
      %cst_110 = arith.constant dense<0.000000e+00> : vector<8x128xf32>
      %169 = tpu.matmul %163, %100, %cst_110 {dimension_numbers = #tpu.dot_dimension_numbers<[1], [0], [0], [1], [0, 0, 1, 1], [], []>} : vector<8x128xbf16>, vector<128x128xbf16>, vector<8x128xf32> -> vector<8x128xf32>
      %170 = arith.addf %168, %169 : vector<8x128xf32>
      %cst_111 = arith.constant 0.000000e+00 : f32
      %171 = vector.broadcast %cst_111 : f32 to vector<8x128xf32>
      %172 = arith.maximumf %170, %171 : vector<8x128xf32>
      %c4_112 = arith.constant 4 : index
      %c0_113 = arith.constant 0 : index
      %c0_114 = arith.constant 0 : index
      %173 = vector.load %arg11[%c4_112, %c0_113, %c0_114] : memref<9x8x128xf32, #tpu.memory_space<vmem>>, vector<1x8x128xf32>
      %174 = vector.shape_cast %173 : vector<1x8x128xf32> to vector<8x128xf32>
      %175 = vector.shape_cast %172 : vector<8x128xf32> to vector<1x8x128xf32>
      tpu.vector_store %arg11[%c4_112, %c0_113, %c0_114], %175 {strides = array<i32>} : memref<9x8x128xf32, #tpu.memory_space<vmem>>, vector<1x8x128xf32>,
      %176 = arith.truncf %172 : vector<8x128xf32> to vector<8x128xbf16>
      %177 = vector.extract_strided_slice %110 {offsets = [5, 0, 0], sizes = [1, 8, 128], strides = [1, 1, 1]} : vector<9x8x128xf32> to vector<1x8x128xf32>
      %178 = vector.shape_cast %177 : vector<1x8x128xf32> to vector<8x128xf32>
      %179 = vector.extract_strided_slice %110 {offsets = [3, 0, 0], sizes = [1, 8, 128], strides = [1, 1, 1]} : vector<9x8x128xf32> to vector<1x8x128xf32>
      %180 = vector.shape_cast %179 : vector<1x8x128xf32> to vector<8x128xf32>
      %181 = arith.select %18, %178, %180 : vector<8x128xi1>, vector<8x128xf32>
      %cst_115 = arith.constant dense<0.000000e+00> : vector<8x128xf32>
      %182 = tpu.matmul %176, %100, %cst_115 {dimension_numbers = #tpu.dot_dimension_numbers<[1], [0], [0], [1], [0, 0, 1, 1], [], []>} : vector<8x128xbf16>, vector<128x128xbf16>, vector<8x128xf32> -> vector<8x128xf32>
      %183 = arith.addf %181, %182 : vector<8x128xf32>
      %cst_116 = arith.constant 0.000000e+00 : f32
      %184 = vector.broadcast %cst_116 : f32 to vector<8x128xf32>
      %185 = arith.maximumf %183, %184 : vector<8x128xf32>
      %c5_117 = arith.constant 5 : index
      %c0_118 = arith.constant 0 : index
      %c0_119 = arith.constant 0 : index
      %186 = vector.load %arg11[%c5_117, %c0_118, %c0_119] : memref<9x8x128xf32, #tpu.memory_space<vmem>>, vector<1x8x128xf32>
      %187 = vector.shape_cast %186 : vector<1x8x128xf32> to vector<8x128xf32>
      %188 = vector.shape_cast %185 : vector<8x128xf32> to vector<1x8x128xf32>
      tpu.vector_store %arg11[%c5_117, %c0_118, %c0_119], %188 {strides = array<i32>} : memref<9x8x128xf32, #tpu.memory_space<vmem>>, vector<1x8x128xf32>,
      %189 = arith.truncf %185 : vector<8x128xf32> to vector<8x128xbf16>
      %190 = vector.extract_strided_slice %110 {offsets = [6, 0, 0], sizes = [1, 8, 128], strides = [1, 1, 1]} : vector<9x8x128xf32> to vector<1x8x128xf32>
      %191 = vector.shape_cast %190 : vector<1x8x128xf32> to vector<8x128xf32>
      %192 = vector.extract_strided_slice %110 {offsets = [2, 0, 0], sizes = [1, 8, 128], strides = [1, 1, 1]} : vector<9x8x128xf32> to vector<1x8x128xf32>
      %193 = vector.shape_cast %192 : vector<1x8x128xf32> to vector<8x128xf32>
      %194 = arith.select %18, %191, %193 : vector<8x128xi1>, vector<8x128xf32>
      %cst_120 = arith.constant dense<0.000000e+00> : vector<8x128xf32>
      %195 = tpu.matmul %189, %100, %cst_120 {dimension_numbers = #tpu.dot_dimension_numbers<[1], [0], [0], [1], [0, 0, 1, 1], [], []>} : vector<8x128xbf16>, vector<128x128xbf16>, vector<8x128xf32> -> vector<8x128xf32>
      %196 = arith.addf %194, %195 : vector<8x128xf32>
      %cst_121 = arith.constant 0.000000e+00 : f32
      %197 = vector.broadcast %cst_121 : f32 to vector<8x128xf32>
      %198 = arith.maximumf %196, %197 : vector<8x128xf32>
      %c6_122 = arith.constant 6 : index
      %c0_123 = arith.constant 0 : index
      %c0_124 = arith.constant 0 : index
      %199 = vector.load %arg11[%c6_122, %c0_123, %c0_124] : memref<9x8x128xf32, #tpu.memory_space<vmem>>, vector<1x8x128xf32>
      %200 = vector.shape_cast %199 : vector<1x8x128xf32> to vector<8x128xf32>
      %201 = vector.shape_cast %198 : vector<8x128xf32> to vector<1x8x128xf32>
      tpu.vector_store %arg11[%c6_122, %c0_123, %c0_124], %201 {strides = array<i32>} : memref<9x8x128xf32, #tpu.memory_space<vmem>>, vector<1x8x128xf32>,
      %202 = arith.truncf %198 : vector<8x128xf32> to vector<8x128xbf16>
      %203 = vector.extract_strided_slice %110 {offsets = [7, 0, 0], sizes = [1, 8, 128], strides = [1, 1, 1]} : vector<9x8x128xf32> to vector<1x8x128xf32>
      %204 = vector.shape_cast %203 : vector<1x8x128xf32> to vector<8x128xf32>
      %205 = vector.extract_strided_slice %110 {offsets = [1, 0, 0], sizes = [1, 8, 128], strides = [1, 1, 1]} : vector<9x8x128xf32> to vector<1x8x128xf32>
      %206 = vector.shape_cast %205 : vector<1x8x128xf32> to vector<8x128xf32>
      %207 = arith.select %18, %204, %206 : vector<8x128xi1>, vector<8x128xf32>
      %cst_125 = arith.constant dense<0.000000e+00> : vector<8x128xf32>
      %208 = tpu.matmul %202, %100, %cst_125 {dimension_numbers = #tpu.dot_dimension_numbers<[1], [0], [0], [1], [0, 0, 1, 1], [], []>} : vector<8x128xbf16>, vector<128x128xbf16>, vector<8x128xf32> -> vector<8x128xf32>
      %209 = arith.addf %207, %208 : vector<8x128xf32>
      %cst_126 = arith.constant 0.000000e+00 : f32
      %210 = vector.broadcast %cst_126 : f32 to vector<8x128xf32>
      %211 = arith.maximumf %209, %210 : vector<8x128xf32>
      %c7_127 = arith.constant 7 : index
      %c0_128 = arith.constant 0 : index
      %c0_129 = arith.constant 0 : index
      %212 = vector.load %arg11[%c7_127, %c0_128, %c0_129] : memref<9x8x128xf32, #tpu.memory_space<vmem>>, vector<1x8x128xf32>
      %213 = vector.shape_cast %212 : vector<1x8x128xf32> to vector<8x128xf32>
      %214 = vector.shape_cast %211 : vector<8x128xf32> to vector<1x8x128xf32>
      tpu.vector_store %arg11[%c7_127, %c0_128, %c0_129], %214 {strides = array<i32>} : memref<9x8x128xf32, #tpu.memory_space<vmem>>, vector<1x8x128xf32>,
      %215 = arith.truncf %211 : vector<8x128xf32> to vector<8x128xbf16>
      %216 = vector.extract_strided_slice %110 {offsets = [8, 0, 0], sizes = [1, 8, 128], strides = [1, 1, 1]} : vector<9x8x128xf32> to vector<1x8x128xf32>
      %217 = vector.shape_cast %216 : vector<1x8x128xf32> to vector<8x128xf32>
      %218 = vector.extract_strided_slice %110 {offsets = [0, 0, 0], sizes = [1, 8, 128], strides = [1, 1, 1]} : vector<9x8x128xf32> to vector<1x8x128xf32>
      %219 = vector.shape_cast %218 : vector<1x8x128xf32> to vector<8x128xf32>
      %220 = arith.select %18, %217, %219 : vector<8x128xi1>, vector<8x128xf32>
      %cst_130 = arith.constant dense<0.000000e+00> : vector<8x128xf32>
      %221 = tpu.matmul %215, %100, %cst_130 {dimension_numbers = #tpu.dot_dimension_numbers<[1], [0], [0], [1], [0, 0, 1, 1], [], []>} : vector<8x128xbf16>, vector<128x128xbf16>, vector<8x128xf32> -> vector<8x128xf32>
      %222 = arith.addf %220, %221 : vector<8x128xf32>
      %cst_131 = arith.constant 0.000000e+00 : f32
      %223 = vector.broadcast %cst_131 : f32 to vector<8x128xf32>
      %224 = arith.maximumf %222, %223 : vector<8x128xf32>
      %c8_132 = arith.constant 8 : index
      %c0_133 = arith.constant 0 : index
      %c0_134 = arith.constant 0 : index
      %225 = vector.load %arg11[%c8_132, %c0_133, %c0_134] : memref<9x8x128xf32, #tpu.memory_space<vmem>>, vector<1x8x128xf32>
      %226 = vector.shape_cast %225 : vector<1x8x128xf32> to vector<8x128xf32>
      %227 = vector.shape_cast %224 : vector<8x128xf32> to vector<1x8x128xf32>
      tpu.vector_store %arg11[%c8_132, %c0_133, %c0_134], %227 {strides = array<i32>} : memref<9x8x128xf32, #tpu.memory_space<vmem>>, vector<1x8x128xf32>,
      %c0_135 = arith.constant 0 : index
      %c0_136 = arith.constant 0 : index
      %c0_137 = arith.constant 0 : index
      %228 = vector.load %arg11[%c0_135, %c0_136, %c0_137] : memref<9x8x128xf32, #tpu.memory_space<vmem>>, vector<1x8x128xf32>
      %229 = vector.shape_cast %228 : vector<1x8x128xf32> to vector<8x128xf32>
      %c8_138 = arith.constant 8 : index
      %c0_139 = arith.constant 0 : index
      %c0_140 = arith.constant 0 : index
      %230 = vector.load %arg11[%c8_138, %c0_139, %c0_140] : memref<9x8x128xf32, #tpu.memory_space<vmem>>, vector<1x8x128xf32>
      %231 = vector.shape_cast %230 : vector<1x8x128xf32> to vector<8x128xf32>
      %232 = arith.select %18, %229, %231 : vector<8x128xi1>, vector<8x128xf32>
      %c0_141 = arith.constant 0 : index
      %c0_142 = arith.constant 0 : index
      %c0_143 = arith.constant 0 : index
      %233 = vector.load %arg10[%c0_141, %c0_142, %c0_143] : memref<9x8x128xf32, #tpu.memory_space<vmem>>, vector<1x8x128xf32>
      %234 = vector.shape_cast %233 : vector<1x8x128xf32> to vector<8x128xf32>
      %235 = vector.shape_cast %232 : vector<8x128xf32> to vector<1x8x128xf32>
      tpu.vector_store %arg10[%c0_141, %c0_142, %c0_143], %235 {strides = array<i32>} : memref<9x8x128xf32, #tpu.memory_space<vmem>>, vector<1x8x128xf32>,
      %c1_144 = arith.constant 1 : index
      %c0_145 = arith.constant 0 : index
      %c0_146 = arith.constant 0 : index
      %236 = vector.load %arg11[%c1_144, %c0_145, %c0_146] : memref<9x8x128xf32, #tpu.memory_space<vmem>>, vector<1x8x128xf32>
      %237 = vector.shape_cast %236 : vector<1x8x128xf32> to vector<8x128xf32>
      %c7_147 = arith.constant 7 : index
      %c0_148 = arith.constant 0 : index
      %c0_149 = arith.constant 0 : index
      %238 = vector.load %arg11[%c7_147, %c0_148, %c0_149] : memref<9x8x128xf32, #tpu.memory_space<vmem>>, vector<1x8x128xf32>
      %239 = vector.shape_cast %238 : vector<1x8x128xf32> to vector<8x128xf32>
      %240 = arith.select %18, %237, %239 : vector<8x128xi1>, vector<8x128xf32>
      %c1_150 = arith.constant 1 : index
      %c0_151 = arith.constant 0 : index
      %c0_152 = arith.constant 0 : index
      %241 = vector.load %arg10[%c1_150, %c0_151, %c0_152] : memref<9x8x128xf32, #tpu.memory_space<vmem>>, vector<1x8x128xf32>
      %242 = vector.shape_cast %241 : vector<1x8x128xf32> to vector<8x128xf32>
      %243 = vector.shape_cast %240 : vector<8x128xf32> to vector<1x8x128xf32>
      tpu.vector_store %arg10[%c1_150, %c0_151, %c0_152], %243 {strides = array<i32>} : memref<9x8x128xf32, #tpu.memory_space<vmem>>, vector<1x8x128xf32>,
      %c2_153 = arith.constant 2 : index
      %c0_154 = arith.constant 0 : index
      %c0_155 = arith.constant 0 : index
      %244 = vector.load %arg11[%c2_153, %c0_154, %c0_155] : memref<9x8x128xf32, #tpu.memory_space<vmem>>, vector<1x8x128xf32>
      %245 = vector.shape_cast %244 : vector<1x8x128xf32> to vector<8x128xf32>
      %c6_156 = arith.constant 6 : index
      %c0_157 = arith.constant 0 : index
      %c0_158 = arith.constant 0 : index
      %246 = vector.load %arg11[%c6_156, %c0_157, %c0_158] : memref<9x8x128xf32, #tpu.memory_space<vmem>>, vector<1x8x128xf32>
      %247 = vector.shape_cast %246 : vector<1x8x128xf32> to vector<8x128xf32>
      %248 = arith.select %18, %245, %247 : vector<8x128xi1>, vector<8x128xf32>
      %c2_159 = arith.constant 2 : index
      %c0_160 = arith.constant 0 : index
      %c0_161 = arith.constant 0 : index
      %249 = vector.load %arg10[%c2_159, %c0_160, %c0_161] : memref<9x8x128xf32, #tpu.memory_space<vmem>>, vector<1x8x128xf32>
      %250 = vector.shape_cast %249 : vector<1x8x128xf32> to vector<8x128xf32>
      %251 = vector.shape_cast %248 : vector<8x128xf32> to vector<1x8x128xf32>
      tpu.vector_store %arg10[%c2_159, %c0_160, %c0_161], %251 {strides = array<i32>} : memref<9x8x128xf32, #tpu.memory_space<vmem>>, vector<1x8x128xf32>,
      %c3_162 = arith.constant 3 : index
      %c0_163 = arith.constant 0 : index
      %c0_164 = arith.constant 0 : index
      %252 = vector.load %arg11[%c3_162, %c0_163, %c0_164] : memref<9x8x128xf32, #tpu.memory_space<vmem>>, vector<1x8x128xf32>
      %253 = vector.shape_cast %252 : vector<1x8x128xf32> to vector<8x128xf32>
      %c5_165 = arith.constant 5 : index
      %c0_166 = arith.constant 0 : index
      %c0_167 = arith.constant 0 : index
      %254 = vector.load %arg11[%c5_165, %c0_166, %c0_167] : memref<9x8x128xf32, #tpu.memory_space<vmem>>, vector<1x8x128xf32>
      %255 = vector.shape_cast %254 : vector<1x8x128xf32> to vector<8x128xf32>
      %256 = arith.select %18, %253, %255 : vector<8x128xi1>, vector<8x128xf32>
      %c3_168 = arith.constant 3 : index
      %c0_169 = arith.constant 0 : index
      %c0_170 = arith.constant 0 : index
      %257 = vector.load %arg10[%c3_168, %c0_169, %c0_170] : memref<9x8x128xf32, #tpu.memory_space<vmem>>, vector<1x8x128xf32>
      %258 = vector.shape_cast %257 : vector<1x8x128xf32> to vector<8x128xf32>
      %259 = vector.shape_cast %256 : vector<8x128xf32> to vector<1x8x128xf32>
      tpu.vector_store %arg10[%c3_168, %c0_169, %c0_170], %259 {strides = array<i32>} : memref<9x8x128xf32, #tpu.memory_space<vmem>>, vector<1x8x128xf32>,
      %c4_171 = arith.constant 4 : index
      %c0_172 = arith.constant 0 : index
      %c0_173 = arith.constant 0 : index
      %260 = vector.load %arg11[%c4_171, %c0_172, %c0_173] : memref<9x8x128xf32, #tpu.memory_space<vmem>>, vector<1x8x128xf32>
      %261 = vector.shape_cast %260 : vector<1x8x128xf32> to vector<8x128xf32>
      %c4_174 = arith.constant 4 : index
      %c0_175 = arith.constant 0 : index
      %c0_176 = arith.constant 0 : index
      %262 = vector.load %arg11[%c4_174, %c0_175, %c0_176] : memref<9x8x128xf32, #tpu.memory_space<vmem>>, vector<1x8x128xf32>
      %263 = vector.shape_cast %262 : vector<1x8x128xf32> to vector<8x128xf32>
      %264 = arith.select %18, %261, %263 : vector<8x128xi1>, vector<8x128xf32>
      %c4_177 = arith.constant 4 : index
      %c0_178 = arith.constant 0 : index
      %c0_179 = arith.constant 0 : index
      %265 = vector.load %arg10[%c4_177, %c0_178, %c0_179] : memref<9x8x128xf32, #tpu.memory_space<vmem>>, vector<1x8x128xf32>
      %266 = vector.shape_cast %265 : vector<1x8x128xf32> to vector<8x128xf32>
      %267 = vector.shape_cast %264 : vector<8x128xf32> to vector<1x8x128xf32>
      tpu.vector_store %arg10[%c4_177, %c0_178, %c0_179], %267 {strides = array<i32>} : memref<9x8x128xf32, #tpu.memory_space<vmem>>, vector<1x8x128xf32>,
      %c5_180 = arith.constant 5 : index
      %c0_181 = arith.constant 0 : index
      %c0_182 = arith.constant 0 : index
      %268 = vector.load %arg11[%c5_180, %c0_181, %c0_182] : memref<9x8x128xf32, #tpu.memory_space<vmem>>, vector<1x8x128xf32>
      %269 = vector.shape_cast %268 : vector<1x8x128xf32> to vector<8x128xf32>
      %c3_183 = arith.constant 3 : index
      %c0_184 = arith.constant 0 : index
      %c0_185 = arith.constant 0 : index
      %270 = vector.load %arg11[%c3_183, %c0_184, %c0_185] : memref<9x8x128xf32, #tpu.memory_space<vmem>>, vector<1x8x128xf32>
      %271 = vector.shape_cast %270 : vector<1x8x128xf32> to vector<8x128xf32>
      %272 = arith.select %18, %269, %271 : vector<8x128xi1>, vector<8x128xf32>
      %c5_186 = arith.constant 5 : index
      %c0_187 = arith.constant 0 : index
      %c0_188 = arith.constant 0 : index
      %273 = vector.load %arg10[%c5_186, %c0_187, %c0_188] : memref<9x8x128xf32, #tpu.memory_space<vmem>>, vector<1x8x128xf32>
      %274 = vector.shape_cast %273 : vector<1x8x128xf32> to vector<8x128xf32>
      %275 = vector.shape_cast %272 : vector<8x128xf32> to vector<1x8x128xf32>
      tpu.vector_store %arg10[%c5_186, %c0_187, %c0_188], %275 {strides = array<i32>} : memref<9x8x128xf32, #tpu.memory_space<vmem>>, vector<1x8x128xf32>,
      %c6_189 = arith.constant 6 : index
      %c0_190 = arith.constant 0 : index
      %c0_191 = arith.constant 0 : index
      %276 = vector.load %arg11[%c6_189, %c0_190, %c0_191] : memref<9x8x128xf32, #tpu.memory_space<vmem>>, vector<1x8x128xf32>
      %277 = vector.shape_cast %276 : vector<1x8x128xf32> to vector<8x128xf32>
      %c2_192 = arith.constant 2 : index
      %c0_193 = arith.constant 0 : index
      %c0_194 = arith.constant 0 : index
      %278 = vector.load %arg11[%c2_192, %c0_193, %c0_194] : memref<9x8x128xf32, #tpu.memory_space<vmem>>, vector<1x8x128xf32>
      %279 = vector.shape_cast %278 : vector<1x8x128xf32> to vector<8x128xf32>
      %280 = arith.select %18, %277, %279 : vector<8x128xi1>, vector<8x128xf32>
      %c6_195 = arith.constant 6 : index
      %c0_196 = arith.constant 0 : index
      %c0_197 = arith.constant 0 : index
      %281 = vector.load %arg10[%c6_195, %c0_196, %c0_197] : memref<9x8x128xf32, #tpu.memory_space<vmem>>, vector<1x8x128xf32>
      %282 = vector.shape_cast %281 : vector<1x8x128xf32> to vector<8x128xf32>
      %283 = vector.shape_cast %280 : vector<8x128xf32> to vector<1x8x128xf32>
      tpu.vector_store %arg10[%c6_195, %c0_196, %c0_197], %283 {strides = array<i32>} : memref<9x8x128xf32, #tpu.memory_space<vmem>>, vector<1x8x128xf32>,
      %c7_198 = arith.constant 7 : index
      %c0_199 = arith.constant 0 : index
      %c0_200 = arith.constant 0 : index
      %284 = vector.load %arg11[%c7_198, %c0_199, %c0_200] : memref<9x8x128xf32, #tpu.memory_space<vmem>>, vector<1x8x128xf32>
      %285 = vector.shape_cast %284 : vector<1x8x128xf32> to vector<8x128xf32>
      %c1_201 = arith.constant 1 : index
      %c0_202 = arith.constant 0 : index
      %c0_203 = arith.constant 0 : index
      %286 = vector.load %arg11[%c1_201, %c0_202, %c0_203] : memref<9x8x128xf32, #tpu.memory_space<vmem>>, vector<1x8x128xf32>
      %287 = vector.shape_cast %286 : vector<1x8x128xf32> to vector<8x128xf32>
      %288 = arith.select %18, %285, %287 : vector<8x128xi1>, vector<8x128xf32>
      %c7_204 = arith.constant 7 : index
      %c0_205 = arith.constant 0 : index
      %c0_206 = arith.constant 0 : index
      %289 = vector.load %arg10[%c7_204, %c0_205, %c0_206] : memref<9x8x128xf32, #tpu.memory_space<vmem>>, vector<1x8x128xf32>
      %290 = vector.shape_cast %289 : vector<1x8x128xf32> to vector<8x128xf32>
      %291 = vector.shape_cast %288 : vector<8x128xf32> to vector<1x8x128xf32>
      tpu.vector_store %arg10[%c7_204, %c0_205, %c0_206], %291 {strides = array<i32>} : memref<9x8x128xf32, #tpu.memory_space<vmem>>, vector<1x8x128xf32>,
      %c8_207 = arith.constant 8 : index
      %c0_208 = arith.constant 0 : index
      %c0_209 = arith.constant 0 : index
      %292 = vector.load %arg11[%c8_207, %c0_208, %c0_209] : memref<9x8x128xf32, #tpu.memory_space<vmem>>, vector<1x8x128xf32>
      %293 = vector.shape_cast %292 : vector<1x8x128xf32> to vector<8x128xf32>
      %c0_210 = arith.constant 0 : index
      %c0_211 = arith.constant 0 : index
      %c0_212 = arith.constant 0 : index
      %294 = vector.load %arg11[%c0_210, %c0_211, %c0_212] : memref<9x8x128xf32, #tpu.memory_space<vmem>>, vector<1x8x128xf32>
      %295 = vector.shape_cast %294 : vector<1x8x128xf32> to vector<8x128xf32>
      %296 = arith.select %18, %293, %295 : vector<8x128xi1>, vector<8x128xf32>
      %c8_213 = arith.constant 8 : index
      %c0_214 = arith.constant 0 : index
      %c0_215 = arith.constant 0 : index
      %297 = vector.load %arg10[%c8_213, %c0_214, %c0_215] : memref<9x8x128xf32, #tpu.memory_space<vmem>>, vector<1x8x128xf32>
      %298 = vector.shape_cast %297 : vector<1x8x128xf32> to vector<8x128xf32>
      %299 = vector.shape_cast %296 : vector<8x128xf32> to vector<1x8x128xf32>
      tpu.vector_store %arg10[%c8_213, %c0_214, %c0_215], %299 {strides = array<i32>} : memref<9x8x128xf32, #tpu.memory_space<vmem>>, vector<1x8x128xf32>,
    }
    %c15_i32_10 = arith.constant 15 : i32
    %cst = arith.constant 0.000000e+00 : f32
    %22 = vector.broadcast %cst : f32 to vector<8x128xf32>
    %c0_11 = arith.constant 0 : index
    %c0_12 = arith.constant 0 : index
    %c0_13 = arith.constant 0 : index
    %23 = vector.load %arg10[%c0_11, %c0_12, %c0_13] : memref<9x8x128xf32, #tpu.memory_space<vmem>>, vector<1x8x128xf32>
    %24 = vector.shape_cast %23 : vector<1x8x128xf32> to vector<8x128xf32>
    %c0_14 = arith.constant 0 : index
    %c0_15 = arith.constant 0 : index
    %c0_16 = arith.constant 0 : index
    %25 = vector.load %arg5[%c0_14, %c0_15, %c0_16] : memref<9x128x128xf32, #tpu.memory_space<vmem>>, vector<1x128x128xf32>
    %26 = vector.shape_cast %25 : vector<1x128x128xf32> to vector<128x128xf32>
    %cst_17 = arith.constant dense<0.000000e+00> : vector<8x128xf32>
    %27 = tpu.matmul %24, %26, %cst_17 {dimension_numbers = #tpu.dot_dimension_numbers<[1], [0], [0], [1], [0, 0, 1, 1], [], []>} : vector<8x128xf32>, vector<128x128xf32>, vector<8x128xf32> -> vector<8x128xf32>
    %28 = arith.addf %22, %27 : vector<8x128xf32>
    %c1 = arith.constant 1 : index
    %c0_18 = arith.constant 0 : index
    %c0_19 = arith.constant 0 : index
    %29 = vector.load %arg10[%c1, %c0_18, %c0_19] : memref<9x8x128xf32, #tpu.memory_space<vmem>>, vector<1x8x128xf32>
    %30 = vector.shape_cast %29 : vector<1x8x128xf32> to vector<8x128xf32>
    %c1_20 = arith.constant 1 : index
    %c0_21 = arith.constant 0 : index
    %c0_22 = arith.constant 0 : index
    %31 = vector.load %arg5[%c1_20, %c0_21, %c0_22] : memref<9x128x128xf32, #tpu.memory_space<vmem>>, vector<1x128x128xf32>
    %32 = vector.shape_cast %31 : vector<1x128x128xf32> to vector<128x128xf32>
    %cst_23 = arith.constant dense<0.000000e+00> : vector<8x128xf32>
    %33 = tpu.matmul %30, %32, %cst_23 {dimension_numbers = #tpu.dot_dimension_numbers<[1], [0], [0], [1], [0, 0, 1, 1], [], []>} : vector<8x128xf32>, vector<128x128xf32>, vector<8x128xf32> -> vector<8x128xf32>
    %34 = arith.addf %28, %33 : vector<8x128xf32>
    %c2 = arith.constant 2 : index
    %c0_24 = arith.constant 0 : index
    %c0_25 = arith.constant 0 : index
    %35 = vector.load %arg10[%c2, %c0_24, %c0_25] : memref<9x8x128xf32, #tpu.memory_space<vmem>>, vector<1x8x128xf32>
    %36 = vector.shape_cast %35 : vector<1x8x128xf32> to vector<8x128xf32>
    %c2_26 = arith.constant 2 : index
    %c0_27 = arith.constant 0 : index
    %c0_28 = arith.constant 0 : index
    %37 = vector.load %arg5[%c2_26, %c0_27, %c0_28] : memref<9x128x128xf32, #tpu.memory_space<vmem>>, vector<1x128x128xf32>
    %38 = vector.shape_cast %37 : vector<1x128x128xf32> to vector<128x128xf32>
    %cst_29 = arith.constant dense<0.000000e+00> : vector<8x128xf32>
    %39 = tpu.matmul %36, %38, %cst_29 {dimension_numbers = #tpu.dot_dimension_numbers<[1], [0], [0], [1], [0, 0, 1, 1], [], []>} : vector<8x128xf32>, vector<128x128xf32>, vector<8x128xf32> -> vector<8x128xf32>
    %40 = arith.addf %34, %39 : vector<8x128xf32>
    %c3 = arith.constant 3 : index
    %c0_30 = arith.constant 0 : index
    %c0_31 = arith.constant 0 : index
    %41 = vector.load %arg10[%c3, %c0_30, %c0_31] : memref<9x8x128xf32, #tpu.memory_space<vmem>>, vector<1x8x128xf32>
    %42 = vector.shape_cast %41 : vector<1x8x128xf32> to vector<8x128xf32>
    %c3_32 = arith.constant 3 : index
    %c0_33 = arith.constant 0 : index
    %c0_34 = arith.constant 0 : index
    %43 = vector.load %arg5[%c3_32, %c0_33, %c0_34] : memref<9x128x128xf32, #tpu.memory_space<vmem>>, vector<1x128x128xf32>
    %44 = vector.shape_cast %43 : vector<1x128x128xf32> to vector<128x128xf32>
    %cst_35 = arith.constant dense<0.000000e+00> : vector<8x128xf32>
    %45 = tpu.matmul %42, %44, %cst_35 {dimension_numbers = #tpu.dot_dimension_numbers<[1], [0], [0], [1], [0, 0, 1, 1], [], []>} : vector<8x128xf32>, vector<128x128xf32>, vector<8x128xf32> -> vector<8x128xf32>
    %46 = arith.addf %40, %45 : vector<8x128xf32>
    %c4 = arith.constant 4 : index
    %c0_36 = arith.constant 0 : index
    %c0_37 = arith.constant 0 : index
    %47 = vector.load %arg10[%c4, %c0_36, %c0_37] : memref<9x8x128xf32, #tpu.memory_space<vmem>>, vector<1x8x128xf32>
    %48 = vector.shape_cast %47 : vector<1x8x128xf32> to vector<8x128xf32>
    %c4_38 = arith.constant 4 : index
    %c0_39 = arith.constant 0 : index
    %c0_40 = arith.constant 0 : index
    %49 = vector.load %arg5[%c4_38, %c0_39, %c0_40] : memref<9x128x128xf32, #tpu.memory_space<vmem>>, vector<1x128x128xf32>
    %50 = vector.shape_cast %49 : vector<1x128x128xf32> to vector<128x128xf32>
    %cst_41 = arith.constant dense<0.000000e+00> : vector<8x128xf32>
    %51 = tpu.matmul %48, %50, %cst_41 {dimension_numbers = #tpu.dot_dimension_numbers<[1], [0], [0], [1], [0, 0, 1, 1], [], []>} : vector<8x128xf32>, vector<128x128xf32>, vector<8x128xf32> -> vector<8x128xf32>
    %52 = arith.addf %46, %51 : vector<8x128xf32>
    %c5 = arith.constant 5 : index
    %c0_42 = arith.constant 0 : index
    %c0_43 = arith.constant 0 : index
    %53 = vector.load %arg10[%c5, %c0_42, %c0_43] : memref<9x8x128xf32, #tpu.memory_space<vmem>>, vector<1x8x128xf32>
    %54 = vector.shape_cast %53 : vector<1x8x128xf32> to vector<8x128xf32>
    %c5_44 = arith.constant 5 : index
    %c0_45 = arith.constant 0 : index
    %c0_46 = arith.constant 0 : index
    %55 = vector.load %arg5[%c5_44, %c0_45, %c0_46] : memref<9x128x128xf32, #tpu.memory_space<vmem>>, vector<1x128x128xf32>
    %56 = vector.shape_cast %55 : vector<1x128x128xf32> to vector<128x128xf32>
    %cst_47 = arith.constant dense<0.000000e+00> : vector<8x128xf32>
    %57 = tpu.matmul %54, %56, %cst_47 {dimension_numbers = #tpu.dot_dimension_numbers<[1], [0], [0], [1], [0, 0, 1, 1], [], []>} : vector<8x128xf32>, vector<128x128xf32>, vector<8x128xf32> -> vector<8x128xf32>
    %58 = arith.addf %52, %57 : vector<8x128xf32>
    %c6 = arith.constant 6 : index
    %c0_48 = arith.constant 0 : index
    %c0_49 = arith.constant 0 : index
    %59 = vector.load %arg10[%c6, %c0_48, %c0_49] : memref<9x8x128xf32, #tpu.memory_space<vmem>>, vector<1x8x128xf32>
    %60 = vector.shape_cast %59 : vector<1x8x128xf32> to vector<8x128xf32>
    %c6_50 = arith.constant 6 : index
    %c0_51 = arith.constant 0 : index
    %c0_52 = arith.constant 0 : index
    %61 = vector.load %arg5[%c6_50, %c0_51, %c0_52] : memref<9x128x128xf32, #tpu.memory_space<vmem>>, vector<1x128x128xf32>
    %62 = vector.shape_cast %61 : vector<1x128x128xf32> to vector<128x128xf32>
    %cst_53 = arith.constant dense<0.000000e+00> : vector<8x128xf32>
    %63 = tpu.matmul %60, %62, %cst_53 {dimension_numbers = #tpu.dot_dimension_numbers<[1], [0], [0], [1], [0, 0, 1, 1], [], []>} : vector<8x128xf32>, vector<128x128xf32>, vector<8x128xf32> -> vector<8x128xf32>
    %64 = arith.addf %58, %63 : vector<8x128xf32>
    %c7 = arith.constant 7 : index
    %c0_54 = arith.constant 0 : index
    %c0_55 = arith.constant 0 : index
    %65 = vector.load %arg10[%c7, %c0_54, %c0_55] : memref<9x8x128xf32, #tpu.memory_space<vmem>>, vector<1x8x128xf32>
    %66 = vector.shape_cast %65 : vector<1x8x128xf32> to vector<8x128xf32>
    %c7_56 = arith.constant 7 : index
    %c0_57 = arith.constant 0 : index
    %c0_58 = arith.constant 0 : index
    %67 = vector.load %arg5[%c7_56, %c0_57, %c0_58] : memref<9x128x128xf32, #tpu.memory_space<vmem>>, vector<1x128x128xf32>
    %68 = vector.shape_cast %67 : vector<1x128x128xf32> to vector<128x128xf32>
    %cst_59 = arith.constant dense<0.000000e+00> : vector<8x128xf32>
    %69 = tpu.matmul %66, %68, %cst_59 {dimension_numbers = #tpu.dot_dimension_numbers<[1], [0], [0], [1], [0, 0, 1, 1], [], []>} : vector<8x128xf32>, vector<128x128xf32>, vector<8x128xf32> -> vector<8x128xf32>
    %70 = arith.addf %64, %69 : vector<8x128xf32>
    %c8 = arith.constant 8 : index
    %c0_60 = arith.constant 0 : index
    %c0_61 = arith.constant 0 : index
    %71 = vector.load %arg10[%c8, %c0_60, %c0_61] : memref<9x8x128xf32, #tpu.memory_space<vmem>>, vector<1x8x128xf32>
    %72 = vector.shape_cast %71 : vector<1x8x128xf32> to vector<8x128xf32>
    %c8_62 = arith.constant 8 : index
    %c0_63 = arith.constant 0 : index
    %c0_64 = arith.constant 0 : index
    %73 = vector.load %arg5[%c8_62, %c0_63, %c0_64] : memref<9x128x128xf32, #tpu.memory_space<vmem>>, vector<1x128x128xf32>
    %74 = vector.shape_cast %73 : vector<1x128x128xf32> to vector<128x128xf32>
    %cst_65 = arith.constant dense<0.000000e+00> : vector<8x128xf32>
    %75 = tpu.matmul %72, %74, %cst_65 {dimension_numbers = #tpu.dot_dimension_numbers<[1], [0], [0], [1], [0, 0, 1, 1], [], []>} : vector<8x128xf32>, vector<128x128xf32>, vector<8x128xf32> -> vector<8x128xf32>
    %76 = arith.addf %70, %75 : vector<8x128xf32>
    %c0_66 = arith.constant 0 : index
    %c0_67 = arith.constant 0 : index
    %77 = vector.load %arg6[%c0_66, %c0_67] : memref<1x128xf32, #tpu.memory_space<vmem>>, vector<1x128xf32>
    %78 = vector.broadcast %77 : vector<1x128xf32> to vector<8x128xf32>
    %79 = arith.addf %76, %78 : vector<8x128xf32>
    %cst_68 = arith.constant 0.000000e+00 : f32
    %80 = vector.broadcast %cst_68 : f32 to vector<8x128xf32>
    %81 = arith.maximumf %79, %80 : vector<8x128xf32>
    %c0_69 = arith.constant 0 : index
    %c0_70 = arith.constant 0 : index
    %82 = vector.load %arg7[%c0_69, %c0_70] : memref<128x2xf32, #tpu.memory_space<vmem>>, vector<128x2xf32>
    %cst_71 = arith.constant dense<0.000000e+00> : vector<8x2xf32>
    %83 = tpu.matmul %81, %82, %cst_71 {dimension_numbers = #tpu.dot_dimension_numbers<[1], [0], [0], [1], [0, 0, 1, 1], [], []>} : vector<8x128xf32>, vector<128x2xf32>, vector<8x2xf32> -> vector<8x2xf32>
    %c0_72 = arith.constant 0 : index
    %c0_73 = arith.constant 0 : index
    %84 = vector.load %arg8[%c0_72, %c0_73] : memref<1x2xf32, #tpu.memory_space<vmem>>, vector<1x2xf32>
    %85 = vector.broadcast %84 : vector<1x2xf32> to vector<8x2xf32>
    %86 = arith.addf %83, %85 : vector<8x2xf32>
    %87 = arith.negf %86 : vector<8x2xf32>
    %88 = math.exp %87 : vector<8x2xf32>
    %cst_74 = arith.constant 1.000000e+00 : f32
    %89 = vector.broadcast %cst_74 : f32 to vector<8x2xf32>
    %90 = arith.addf %89, %88 : vector<8x2xf32>
    %91 = arith.divf %89, %90 : vector<8x2xf32>
    %c0_75 = arith.constant 0 : index
    %c0_76 = arith.constant 0 : index
    %92 = vector.load %arg9[%c0_75, %c0_76] : memref<8x2xf32, #tpu.memory_space<vmem>>, vector<8x2xf32>
    tpu.vector_store %arg9[%c0_75, %c0_76], %91 {strides = array<i32>} : memref<8x2xf32, #tpu.memory_space<vmem>>, vector<8x2xf32>,
    return
  }
  func.func @transform_0(%arg0: i32) -> (i32, i32, i32) {
    %c0_i32 = arith.constant 0 : i32
    %c0_i32_0 = arith.constant 0 : i32
    %c0_i32_1 = arith.constant 0 : i32
    return %c0_i32, %arg0, %c0_i32_0 : i32, i32, i32
  }
  func.func @transform_1(%arg0: i32) -> (i32, i32, i32) {
    %c0_i32 = arith.constant 0 : i32
    %c0_i32_0 = arith.constant 0 : i32
    %c0_i32_1 = arith.constant 0 : i32
    %c0_i32_2 = arith.constant 0 : i32
    return %c0_i32, %c0_i32_0, %c0_i32_1 : i32, i32, i32
  }
  func.func @transform_2(%arg0: i32) -> (i32, i32, i32) {
    %c0_i32 = arith.constant 0 : i32
    %c0_i32_0 = arith.constant 0 : i32
    %c0_i32_1 = arith.constant 0 : i32
    %c0_i32_2 = arith.constant 0 : i32
    return %c0_i32, %c0_i32_0, %c0_i32_1 : i32, i32, i32
  }
  func.func @transform_3(%arg0: i32) -> (i32, i32, i32) {
    %c0_i32 = arith.constant 0 : i32
    %c0_i32_0 = arith.constant 0 : i32
    %c0_i32_1 = arith.constant 0 : i32
    %c0_i32_2 = arith.constant 0 : i32
    return %c0_i32, %c0_i32_0, %c0_i32_1 : i32, i32, i32
  }
  func.func @transform_4(%arg0: i32) -> (i32, i32, i32) {
    %c0_i32 = arith.constant 0 : i32
    %c0_i32_0 = arith.constant 0 : i32
    %c0_i32_1 = arith.constant 0 : i32
    %c0_i32_2 = arith.constant 0 : i32
    return %c0_i32, %c0_i32_0, %c0_i32_1 : i32, i32, i32
  }
  func.func @transform_5(%arg0: i32) -> (i32, i32) {
    %c0_i32 = arith.constant 0 : i32
    %c0_i32_0 = arith.constant 0 : i32
    %c0_i32_1 = arith.constant 0 : i32
    return %c0_i32, %c0_i32_0 : i32, i32
  }
  func.func @transform_6(%arg0: i32) -> (i32, i32) {
    %c0_i32 = arith.constant 0 : i32
    %c0_i32_0 = arith.constant 0 : i32
    %c0_i32_1 = arith.constant 0 : i32
    return %c0_i32, %c0_i32_0 : i32, i32
  }
  func.func @transform_7(%arg0: i32) -> (i32, i32) {
    %c0_i32 = arith.constant 0 : i32
    %c0_i32_0 = arith.constant 0 : i32
    %c0_i32_1 = arith.constant 0 : i32
    return %c0_i32, %c0_i32_0 : i32, i32
  }
  func.func @transform_8(%arg0: i32) -> (i32, i32) {
    %c0_i32 = arith.constant 0 : i32
    %c0_i32_0 = arith.constant 0 : i32
    return %arg0, %c0_i32 : i32, i32
  }
}

</mosaic_0001>

<bundles_post_ra>
// kernel: tpu_custom_call.1
= control target key start
LH: loop header
LB: loop body
LE: loop exit
PB: predicated region body
PF: predicated region fallthrough
CT: control target
= control target key end

     0   :  { %13 = vsyncpa [#allocation5], 0  ;;  %s1494_s0 = inlined_call_operand.vmem [shape: f32[9,8,128], index: 0, kind: input, shape index: {}]   ;;  %s1495_s1 = inlined_call_operand.hbm [shape: bf16[15,128,128], index: 1, kind: input, shape index: {}]   ;;  %s1496_s2 = inlined_call_operand.hbm [shape: bf16[15,128,128], index: 2, kind: input, shape index: {}]   ;;  %s1497_s3 = inlined_call_operand.vmem [shape: f32[15,1,128], index: 3, kind: input, shape index: {}]   ;;  %s1498_s4 = inlined_call_operand.hbm [shape: f32[9,128,128], index: 4, kind: input, shape index: {}]   ;;  %s1499_s5 = inlined_call_operand.vmem [shape: f32[1,128], index: 5, kind: input, shape index: {}]   ;;  %s1500_s6 = inlined_call_operand.vmem [shape: f32[128,2], index: 6, kind: input, shape index: {}]   ;;  %s1501_s7 = inlined_call_operand.vmem [shape: f32[1,2], index: 7, kind: input, shape index: {}]   ;;  %s1502_s8 = inlined_call_operand.vmem [shape: f32[8,2], index: 8, kind: output, shape index: {}]  }
   0x1   :  { %14 = vsyncpa [#allocation7], 0  ;;  %s34_s29 = sshll.u32 %s1496_s2, 4  ;;  %s1143_s30 = smov [#allocation6]   ;;  %s35_s29 = int_to_ptr.hbm [resolvable:$true] %s34_s29 }
   0x2   :  { %s36_s9 = sshll.u32 %s1143_s30, 4  ;;  %s21_s12 = sshll.u32 %s1495_s1, 4  ;;  %s37_s9 = int_to_ptr.vmem [resolvable:$true] %s36_s9  ;;  %s22_s12 = int_to_ptr.hbm [resolvable:$true] %s21_s12 }
   0x3   :  { %s1144_s13 = smov 64   ;;  %s1145_s14 = smov 4  }
   0x4   :  { %42 = dma.hbm_to_vmem [thread:$0]  %s35_s29, 15360, %s37_s9, [#allocation7], %s1144_s13, %s1144_s13, %s1145_s14  }
   0x5   :  { %s1146_s15 = smov [#allocation4]   ;;  %s49_s19 = sshll.u32 %s1498_s4, 4  ;;  %s50_s19 = int_to_ptr.hbm [resolvable:$true] %s49_s19 }
   0x6   :  { %s23_s16 = sshll.u32 %s1146_s15, 4  ;;  %s1147_s2 = smov [#allocation8]   ;;  %s24_s16 = int_to_ptr.vmem [resolvable:$true] %s23_s16 }
   0x7   :  { %29 = dma.hbm_to_vmem [thread:$0]  %s22_s12, 15360, %s24_s16, [#allocation5], %s1144_s13, %s1144_s13, %s1145_s14  }
   0x8   :  { %s51_s20 = sshll.u32 %s1147_s2, 4  ;;  %s1148_s21 = smov 128   ;;  %s52_s20 = int_to_ptr.vmem [resolvable:$true] %s51_s20 }
   0x9   :  { %s1149_s22 = smov 8  }
   0xa   :  { %57 = dma.hbm_to_vmem [thread:$0]  %s50_s19, 18432, %s52_s20, [#allocation7], %s1148_s21, %s1148_s21, %s1149_s22  }
   0xb   :  { %1135 = dma.done.wait [#allocation5], 15360  }
   0xc   :  { %1136 = vsyncadd [#allocation5], 4294951936 }
   0xd   :  { %1137 = dma.done.wait [#allocation7], 33792  }
   0xe   :  { %1138 = vsyncadd [#allocation7], 4294933504  ;;  %v77_v0 = vlaneseq  ;;  %v92_v4 = vld [vmem:[%s1494_s0] sm:$0xff]  ;;  %v93_v5 = vld [vmem:[%s1494_s0 + $0x8] sm:$0xff]  ;;  %s1236_s17 = smov 0  }
   0xf   :  { %v94_v6 = vld [vmem:[%s1494_s0 + $0x10] sm:$0xff]  ;;  %101 = vst [vmem:[#allocation2 + $0x30] sm:$0xff] %v92_v4  ;;  %v95_v7 = vld [vmem:[%s1494_s0 + $0x18] sm:$0xff]  ;;  %v96_v8 = vld [vmem:[%s1494_s0 + $0x20] sm:$0xff] }
  0x10   :  { %v78_v1 = vand.u32 127, %v77_v0  ;;  %102 = vst [vmem:[#allocation2] sm:$0xff] %v93_v5  ;;  %v97_v9 = vld [vmem:[%s1494_s0 + $0x28] sm:$0xff]  ;;  %v98_v10 = vld [vmem:[%s1494_s0 + $0x30] sm:$0xff]  ;;  %v99_v11 = vld [vmem:[%s1494_s0 + $0x38] sm:$0xff] }
  0x11   :  { %103 = vst [vmem:[#allocation2 + $0x18] sm:$0xff] %v94_v6  ;;  %v100_v12 = vld [vmem:[%s1494_s0 + $0x40] sm:$0xff] }
  0x12   :  { %v83_v2 = vand.u32 63, %v78_v1  ;;  %104 = vst [vmem:[#allocation2 + $0x10] sm:$0xff] %v95_v7 }
  0x13   :  { %105 = vst [vmem:[#allocation2 + $0x20] sm:$0xff] %v96_v8 }
  0x14   :  { %vm1205_vm0 = vcmp.lt.s32.totalorder %v83_v2, 32  ;;  %106 = vst [vmem:[#allocation2 + $0x28] sm:$0xff] %v97_v9 }
  0x15   :  { %107 = vst [vmem:[#allocation2 + $0x40] sm:$0xff] %v98_v10 }
  0x16   :  { %108 = vst [vmem:[#allocation2 + $0x38] sm:$0xff] %v99_v11 }
  0x17   :  { %109 = vst [vmem:[#allocation2 + $0x8] sm:$0xff] %v100_v12 }
  0x18 LB: > { %s1018_s18 = sshll.u32 %s1141_s17, 6  ;;  %s153_s20 = scalar_lea.vmem %s1497_s3, %s1141_s17  ;;  %v155_v22 = vld [vmem:[#allocation2 + $0x30] sm:$0xff]  ;;  %v156_v23 = vld [vmem:[#allocation2] sm:$0xff]  ;;  %v157_v29 = vld [vmem:[#allocation2 + $0x18] sm:$0xff]  ;;  %v1150_v37 = vmov 0   ;;  %s1141_s17 = sphi %s1236_s17, %s115_s17  }
  0x19   : > { %s118_s21 = scalar_lea.vmem [#allocation4], %s1018_s18  ;;  %s1246_s0 = scalar_lea.vmem [#allocation6], %s1018_s18  ;;  %v164_v24 = vpack.c.bf16 %v156_v23, %v155_v22  ;;  %v158_v30 = vld [vmem:[#allocation2 + $0x10] sm:$0xff]  ;;  %v1052_v45 = vld [vmem:[%s153_s20] ss:$0 sm:$0xff] }
  0x1a   : > { %v1026_v13 = vld [vmem:[%s118_s21 + $0x38] sm:$0xff]  ;;  %v1025_v14 = vld [vmem:[%s118_s21 + $0x30] sm:$0xff]  ;;  %v1024_v15 = vld [vmem:[%s118_s21 + $0x28] sm:$0xff]  ;;  %v165_v31 = vpack.c.bf16 %v158_v30, %v157_v29  ;;  %s115_s17 = sadd.s32 1, %s1141_s17  }
  0x1b   : > { %220 = vmatpush.bf16.msra.mxu0 %v1026_v13  ;;  %v1023_v16 = vld [vmem:[%s118_s21 + $0x20] sm:$0xff]  ;;  %v1022_v17 = vld [vmem:[%s118_s21 + $0x18] sm:$0xff]  ;;  %v1021_v19 = vld [vmem:[%s118_s21 + $0x10] sm:$0xff]  ;;  %p112_p0 = scmp.ge.s32.totalorder %s115_s17, 15  }
  0x1c   : > { %v1249_v18 = vld [vmem:[%s1246_s0 + $0x38] sm:$0xff]  ;;  %v1020_v20 = vld [vmem:[%s118_s21 + $0x8] sm:$0xff]  ;;  %v1019_v21 = vld [vmem:[%s118_s21] sm:$0xff]  ;;  %vm932_vm4 = vcmask (%p112_p0), 15360  }
  0x1d   : > { %302 = vmatpush.bf16.msra.mxu1 %v1249_v18  ;;  %320 = vmatpush.bf16.msra.mxu2 %v1249_v18  ;;  %v1255_v25 = vld [vmem:[%s1246_s0 + $0x30] sm:$0xff]  ;;  %v1259_v26 = vld [vmem:[%s1246_s0 + $0x28] sm:$0xff]  ;;  %v1265_v27 = vld [vmem:[%s1246_s0 + $0x20] sm:$0xff] }
  0x1e   : > { %339 = vmatpush.bf16.msra.mxu3 %v1249_v18  ;;  %v1271_v28 = vld [vmem:[%s1246_s0 + $0x18] sm:$0xff]  ;;  %v1279_v32 = vld [vmem:[%s1246_s0 + $0x10] sm:$0xff]  ;;  %v1283_v33 = vld [vmem:[%s1246_s0 + $0x8] sm:$0xff] }
  0x1f   : > { %221 = vmatpush.bf16.msra.mxu0 %v1025_v14  ;;  %v1289_v34 = vld [vmem:[%s1246_s0] sm:$0xff]  ;;  %v160_v36 = vld [vmem:[#allocation2 + $0x28] sm:$0xff]  ;;  %v162_v40 = vld [vmem:[#allocation2 + $0x38] sm:$0xff] }
  0x20   : > { %v159_v35 = vld [vmem:[#allocation2 + $0x20] sm:$0xff]  ;;  %v163_v42 = vld [vmem:[#allocation2 + $0x8] sm:$0xff] }
  0x21   : > { %303 = vmatpush.bf16.msra.mxu1 %v1255_v25  ;;  %321 = vmatpush.bf16.msra.mxu2 %v1255_v25  ;;  %v166_v38 = vpack.c.bf16 %v160_v36, %v159_v35  ;;  %v161_v39 = vld [vmem:[#allocation2 + $0x40] sm:$0xff]  ;;  %v168_v43 = vpack.c.bf16 %v163_v42, %v163_v42  ;;  %v602_v3 = vld [vmem:[#allocation8 + $0x160] sm:$0xff] (%p112_p0) }
  0x22   : > { %340 = vmatpush.bf16.msra.mxu3 %v1255_v25  ;;  %v167_v41 = vpack.c.bf16 %v162_v40, %v161_v39 }
  0x23   : > { %222 = vmatpush.bf16.msra.mxu0 %v1024_v15 }
  0x25   : > { %304 = vmatpush.bf16.msra.mxu1 %v1259_v26  ;;  %322 = vmatpush.bf16.msra.mxu2 %v1259_v26 }
  0x26   : > { %341 = vmatpush.bf16.msra.mxu3 %v1259_v26 }
  0x27   : > { %223 = vmatpush.bf16.msra.mxu0 %v1023_v16 }
  0x29   : > { %305 = vmatpush.bf16.msra.mxu1 %v1265_v27  ;;  %323 = vmatpush.bf16.msra.mxu2 %v1265_v27 }
  0x2a   : > { %342 = vmatpush.bf16.msra.mxu3 %v1265_v27 }
  0x2b   : > { %224 = vmatpush.bf16.msra.mxu0 %v1022_v17 }
  0x2d   : > { %306 = vmatpush.bf16.msra.mxu1 %v1271_v28  ;;  %324 = vmatpush.bf16.msra.mxu2 %v1271_v28 }
  0x2e   : > { %343 = vmatpush.bf16.msra.mxu3 %v1271_v28 }
  0x2f   : > { %225 = vmatpush.bf16.msra.mxu0 %v1021_v19 }
  0x31   : > { %307 = vmatpush.bf16.msra.mxu1 %v1279_v32  ;;  %325 = vmatpush.bf16.msra.mxu2 %v1279_v32 }
  0x32   : > { %344 = vmatpush.bf16.msra.mxu3 %v1279_v32 }
  0x33   : > { %226 = vmatpush.bf16.msra.mxu0 %v1020_v20 }
  0x35   : > { %308 = vmatpush.bf16.msra.mxu1 %v1283_v33  ;;  %326 = vmatpush.bf16.msra.mxu2 %v1283_v33 }
  0x36   : > { %345 = vmatpush.bf16.msra.mxu3 %v1283_v33 }
  0x37   : > { %227 = vmatpush.bf16.msra.mxu0 %v1019_v21 }
  0x39   : > { %309 = vmatpush.bf16.msra.mxu1 %v1289_v34  ;;  %327 = vmatpush.bf16.msra.mxu2 %v1289_v34 }
  0x3a   : > { %228 = vmatmul.bf16.vlgmr.msra.gmra.mxu0 %v164_v24  ;;  %346 = vmatpush.bf16.msra.mxu3 %v1289_v34 }
  0x3c   : > { %310 = vmatmul.bf16.vlgmr.msra.gmra.mxu1 %v1150_v37 }
  0x3d   : > { %358 = vmatpush.bf16.msrb.mxu1 %v1249_v18  ;;  %376 = vmatpush.bf16.msrb.mxu2 %v1249_v18 }
  0x3e   : > { %395 = vmatpush.bf16.msrb.mxu3 %v1249_v18 }
  0x41   : > { %359 = vmatpush.bf16.msrb.mxu1 %v1255_v25  ;;  %377 = vmatpush.bf16.msrb.mxu2 %v1255_v25 }
  0x42   : > { %396 = vmatpush.bf16.msrb.mxu3 %v1255_v25 }
  0x45   : > { %360 = vmatpush.bf16.msrb.mxu1 %v1259_v26  ;;  %378 = vmatpush.bf16.msrb.mxu2 %v1259_v26 }
  0x46   : > { %397 = vmatpush.bf16.msrb.mxu3 %v1259_v26 }
  0x49   : > { %361 = vmatpush.bf16.msrb.mxu1 %v1265_v27  ;;  %379 = vmatpush.bf16.msrb.mxu2 %v1265_v27 }
  0x4a   : > { %233 = vmatmul.bf16.gmra.mxu0 %v165_v31  ;;  %398 = vmatpush.bf16.msrb.mxu3 %v1265_v27 }
  0x4d   : > { %362 = vmatpush.bf16.msrb.mxu1 %v1271_v28  ;;  %380 = vmatpush.bf16.msrb.mxu2 %v1271_v28 }
  0x4e   : > { %399 = vmatpush.bf16.msrb.mxu3 %v1271_v28 }
  0x51   : > { %363 = vmatpush.bf16.msrb.mxu1 %v1279_v32  ;;  %381 = vmatpush.bf16.msrb.mxu2 %v1279_v32 }
  0x52   : > { %400 = vmatpush.bf16.msrb.mxu3 %v1279_v32 }
  0x55   : > { %364 = vmatpush.bf16.msrb.mxu1 %v1283_v33  ;;  %382 = vmatpush.bf16.msrb.mxu2 %v1283_v33 }
  0x56   : > { %401 = vmatpush.bf16.msrb.mxu3 %v1283_v33 }
  0x59   : > { %365 = vmatpush.bf16.msrb.mxu1 %v1289_v34  ;;  %383 = vmatpush.bf16.msrb.mxu2 %v1289_v34 }
  0x5a   : > { %238 = vmatmul.bf16.gmra.mxu0 %v166_v38  ;;  %402 = vmatpush.bf16.msrb.mxu3 %v1289_v34 }
  0x5d   : > { %414 = vmatpush.bf16.msra.mxu1 %v1249_v18 }
  0x61   : > { %415 = vmatpush.bf16.msra.mxu1 %v1255_v25 }
  0x65   : > { %416 = vmatpush.bf16.msra.mxu1 %v1259_v26 }
  0x69   : > { %417 = vmatpush.bf16.msra.mxu1 %v1265_v27 }
  0x6a   : > { %243 = vmatmul.bf16.gmra.mxu0 %v167_v41 }
  0x6d   : > { %418 = vmatpush.bf16.msra.mxu1 %v1271_v28 }
  0x71   : > { %419 = vmatpush.bf16.msra.mxu1 %v1279_v32 }
  0x75   : > { %420 = vmatpush.bf16.msra.mxu1 %v1283_v33 }
  0x79   : > { %421 = vmatpush.bf16.msra.mxu1 %v1289_v34 }
  0x7a   : > { %248 = vmatmul.bf16.gmra.mxu0 %v168_v43 }
  0xb7   : > { %v229_v44 = vpop.f32.mrf.mxu0 }
  0xb8   : > { %v1369_v6 = vadd.f32 %v1052_v45, %v229_v44 }
  0xb9   : > { %v311_v52 = vpop.f32.mrf.mxu1 }
  0xbf   : > { %v231_v46 = vpop.f32.mrf.mxu0 }
  0xc0   : > { %v1333_v47 = vadd.f32 %v1052_v45, %v231_v46 }
  0xc1   : > { %v313_v55 = vpop.f32.mrf.mxu1 }
  0xc7   : > { %v234_v48 = vpop.f32.mrf.mxu0 }
  0xc8   : > { %v1335_v49 = vadd.f32 %v1052_v45, %v234_v48 }
  0xcf   : > { %v236_v50 = vpop.f32.mrf.mxu0 }
  0xd0   : > { %v1337_v51 = vadd.f32 %v1052_v45, %v236_v50 }
  0xd7   : > { %v239_v53 = vpop.f32.mrf.mxu0 }
  0xd8   : > { %v240_v54 = vadd.f32 %v1052_v45, %v239_v53 }
  0xdf   : > { %v241_v56 = vpop.f32.mrf.mxu0 }
  0xe0   : > { %v1339_v57 = vadd.f32 %v1052_v45, %v241_v56 }
  0xe2   : > { %v357_v58 = vsel %vm1205_vm0, %v1337_v51, %v1339_v57  ;;  %v394_v59 = vsel %vm1205_vm0, %v1339_v57, %v1337_v51 }
  0xe7   : > { %v244_v60 = vpop.f32.mrf.mxu0 }
  0xe8   : > { %v1349_v61 = vadd.f32 %v1052_v45, %v244_v60 }
  0xea   : > { %v338_v62 = vsel %vm1205_vm0, %v1335_v49, %v1349_v61  ;;  %v413_v63 = vsel %vm1205_vm0, %v1349_v61, %v1335_v49  ;;  %v546_v61 = vld [vmem:[#allocation8 + $0xf8] sm:$0xff] (%p112_p0) }
  0xeb   :  { %547 = vmatpush.msra.mxu0 (%p112_p0), %v546_v61  ;;  %v684_v61 = vld [vmem:[#allocation8 + $0x270] sm:$0xff] (%p112_p0) }
  0xef   : > { %v246_v0 = vpop.f32.mrf.mxu0 }
  0xf0   : > { %v1359_v1 = vadd.f32 %v1052_v45, %v246_v0  ;;  %v604_v0 = vld [vmem:[#allocation8 + $0x170] sm:$0xff] (%p112_p0) }
  0xf2   : > { %v319_v2 = vsel %vm1205_vm0, %v1333_v47, %v1359_v1  ;;  %v432_v4 = vsel %vm1205_vm0, %v1359_v1, %v1333_v47  ;;  %v544_v1 = vld [vmem:[#allocation8 + $0xe8] sm:$0xff] (%p112_p0) }
  0xf7   : > { %v249_v5 = vpop.f32.mrf.mxu0 }
  0xf8   : > { %v1371_v7 = vadd.f32 %v1052_v45, %v249_v5  ;;  %v603_v5 = vld [vmem:[#allocation8 + $0x168] sm:$0xff] (%p112_p0) }
  0xfa   : > { %v253_v8 = vsel %vm1205_vm0, %v1369_v6, %v1371_v7  ;;  %v451_v9 = vsel %vm1205_vm0, %v1371_v7, %v1369_v6  ;;  %v644_v6 = vld [vmem:[#allocation8 + $0x1f0] sm:$0xff] (%p112_p0)  ;;  %v543_v7 = vld [vmem:[#allocation8 + $0xe0] sm:$0xff] (%p112_p0) }
  0xfb   : > { %v315_v10 = vadd.f32 %v311_v52, %v253_v8  ;;  %v526_v8 = vld [vmem:[#allocation8 + $0x70] sm:$0xff] (%p112_p0) }
  0xfd   : > { %v1381_v11 = vmax.f32 %v315_v10, 0.0  ;;  %v525_v10 = vld [vmem:[#allocation8 + $0x68] sm:$0xff] (%p112_p0) }
  0xff   : > { %v251_v12 = vpop.f32.mrf.mxu0  ;;  %v318_v13 = vpack.c.bf16 %v1381_v11, %v1381_v11 }
 0x100   :  { %v642_v12 = vld [vmem:[#allocation8 + $0x1e0] sm:$0xff] (%p112_p0) }
 0x101   : > { %328 = vmatmul.bf16.vlgmr.msra.gmra.mxu2 %v318_v13  ;;  %v601_v13 = vld [vmem:[#allocation8 + $0x158] sm:$0xff] (%p112_p0) }
 0x102   : > { %433 = vmatpush.bf16.msra.mxu2 %v1249_v18 }
 0x106   : > { %434 = vmatpush.bf16.msra.mxu2 %v1255_v25 }
 0x10a   : > { %435 = vmatpush.bf16.msra.mxu2 %v1259_v26 }
 0x10e   : > { %436 = vmatpush.bf16.msra.mxu2 %v1265_v27 }
 0x112   : > { %437 = vmatpush.bf16.msra.mxu2 %v1271_v28 }
 0x116   : > { %438 = vmatpush.bf16.msra.mxu2 %v1279_v32 }
 0x11a   : > { %439 = vmatpush.bf16.msra.mxu2 %v1283_v33 }
 0x11e   : > { %440 = vmatpush.bf16.msra.mxu2 %v1289_v34 }
 0x184   : > { %v329_v14 = vpop.f32.mrf.mxu2 }
 0x185   : > { %v333_v15 = vadd.f32 %v329_v14, %v319_v2  ;;  %v645_v2 = vld [vmem:[#allocation8 + $0x1f8] sm:$0xff] (%p112_p0)  ;;  %v524_v14 = vld [vmem:[#allocation8 + $0x60] sm:$0xff] (%p112_p0) }
 0x187   : > { %v334_v16 = vmax.f32 %v333_v15, 0.0  ;;  %v541_v15 = vld [vmem:[#allocation8 + $0xd0] sm:$0xff] (%p112_p0) }
 0x189   : > { %v337_v17 = vpack.c.bf16 %v334_v16, %v334_v16 }
 0x18b   : > { %347 = vmatmul.bf16.vlgmr.msra.gmra.mxu3 %v337_v17  ;;  %v600_v17 = vld [vmem:[#allocation8 + $0x150] sm:$0xff] (%p112_p0) }
 0x18c   : > { %v331_v19 = vpop.f32.mrf.mxu2  ;;  %452 = vmatpush.bf16.msra.mxu3 %v1249_v18 }
 0x18d   :  { %v523_v19 = vld [vmem:[#allocation8 + $0x58] sm:$0xff] (%p112_p0) }
 0x190   : > { %453 = vmatpush.bf16.msra.mxu3 %v1255_v25 }
 0x194   : > { %454 = vmatpush.bf16.msra.mxu3 %v1259_v26 }
 0x198   : > { %455 = vmatpush.bf16.msra.mxu3 %v1265_v27 }
 0x19c   : > { %456 = vmatpush.bf16.msra.mxu3 %v1271_v28 }
 0x1a0   : > { %457 = vmatpush.bf16.msra.mxu3 %v1279_v32 }
 0x1a4   : > { %458 = vmatpush.bf16.msra.mxu3 %v1283_v33 }
 0x1a8   : > { %459 = vmatpush.bf16.msra.mxu3 %v1289_v34 }
 0x20e   : > { %v348_v20 = vpop.f32.mrf.mxu3 }
 0x20f   : > { %v352_v21 = vadd.f32 %v348_v20, %v338_v62  ;;  %v545_v62 = vld [vmem:[#allocation8 + $0xf0] sm:$0xff] (%p112_p0)  ;;  %v540_v20 = vld [vmem:[#allocation8 + $0xc8] sm:$0xff] (%p112_p0) }
 0x210   :  { %548 = vmatpush.msra.mxu0 (%p112_p0), %v545_v62  ;;  %v630_v62 = vld [vmem:[#allocation8 + $0x180] sm:$0xff] (%p112_p0) }
 0x211   : > { %v353_v22 = vmax.f32 %v352_v21, 0.0  ;;  %v640_v21 = vld [vmem:[#allocation8 + $0x1d0] sm:$0xff] (%p112_p0) }
 0x212   :  { %549 = vmatpush.msra.mxu0 (%p112_p0), %v544_v1  ;;  %v683_v1 = vld [vmem:[#allocation8 + $0x268] sm:$0xff] (%p112_p0) }
 0x213   : > { %v356_v23 = vpack.c.bf16 %v353_v22, %v353_v22 }
 0x214   :  { %550 = vmatpush.msra.mxu0 (%p112_p0), %v543_v7  ;;  %v804_v7 = vld [vmem:[#allocation8 + $0x3f0] sm:$0xff] (%p112_p0) }
 0x215   : > { %366 = vmatmul.bf16.vlgmr.msrb.gmra.mxu1 %v356_v23  ;;  %v522_v23 = vld [vmem:[#allocation8 + $0x50] sm:$0xff] (%p112_p0) }
 0x216   : > { %v350_v18 = vpop.f32.mrf.mxu3 }
 0x217   :  { %v539_v18 = vld [vmem:[#allocation8 + $0xc0] sm:$0xff] (%p112_p0) }
 0x292   : > { %v367_v24 = vpop.f32.mrf.mxu1 }
 0x293   : > { %v371_v25 = vadd.f32 %v367_v24, %v357_v58  ;;  %v639_v24 = vld [vmem:[#allocation8 + $0x1c8] sm:$0xff] (%p112_p0) }
 0x295   : > { %v372_v29 = vmax.f32 %v371_v25, 0.0  ;;  %v598_v25 = vld [vmem:[#allocation8 + $0x140] sm:$0xff] (%p112_p0) }
 0x297   : > { %v375_v26 = vpack.c.bf16 %v372_v29, %v372_v29 }
 0x299   : > { %384 = vmatmul.bf16.vlgmr.msrb.gmra.mxu2 %v375_v26  ;;  %v538_v26 = vld [vmem:[#allocation8 + $0xb8] sm:$0xff] (%p112_p0) }
 0x29a   : > { %v369_v27 = vpop.f32.mrf.mxu1 }
 0x29b   :  { %v638_v27 = vld [vmem:[#allocation8 + $0x1c0] sm:$0xff] (%p112_p0) }
 0x31c   : > { %v385_v30 = vpop.f32.mrf.mxu2 }
 0x31d   : > { %v389_v28 = vadd.f32 %v385_v30, %v240_v54  ;;  %v597_v30 = vld [vmem:[#allocation8 + $0x138] sm:$0xff] (%p112_p0) }
 0x31f   : > { %v390_v31 = vmax.f32 %v389_v28, 0.0  ;;  %v520_v28 = vld [vmem:[#allocation8 + $0x40] sm:$0xff] (%p112_p0) }
 0x321   : > { %v393_v32 = vpack.c.bf16 %v390_v31, %v390_v31  ;;  %490 = vst [vmem:[#allocation2 + $0x20] sm:$0xff] %v390_v31  ;;  %v537_v31 = vld [vmem:[#allocation8 + $0xb0] sm:$0xff] (%p112_p0) }
 0x323   : > { %403 = vmatmul.bf16.vlgmr.msrb.gmra.mxu3 %v393_v32  ;;  %v637_v32 = vld [vmem:[#allocation8 + $0x1b8] sm:$0xff] (%p112_p0) }
 0x324   : > { %v387_v33 = vpop.f32.mrf.mxu2 }
 0x325   :  { %v596_v33 = vld [vmem:[#allocation8 + $0x130] sm:$0xff] (%p112_p0) }
 0x3a6   : > { %v404_v34 = vpop.f32.mrf.mxu3 }
 0x3a7   : > { %v408_v35 = vadd.f32 %v404_v34, %v394_v59  ;;  %v519_v34 = vld [vmem:[#allocation8 + $0x38] sm:$0xff] (%p112_p0) }
 0x3a9   : > { %v409_v36 = vmax.f32 %v408_v35, 0.0  ;;  %v536_v35 = vld [vmem:[#allocation8 + $0xa8] sm:$0xff] (%p112_p0) }
 0x3ab   : > { %v412_v37 = vpack.c.bf16 %v409_v36, %v409_v36  ;;  %v485_v38 = vsel %vm1205_vm0, %v372_v29, %v409_v36  ;;  %v493_v39 = vsel %vm1205_vm0, %v409_v36, %v372_v29  ;;  %v521_v29 = vld [vmem:[#allocation8 + $0x48] sm:$0xff] (%p112_p0)  ;;  %v636_v36 = vld [vmem:[#allocation8 + $0x1b0] sm:$0xff] (%p112_p0) }
 0x3ac   : > { %487 = vst [vmem:[#allocation2 + $0x10] sm:$0xff] %v485_v38  ;;  %v518_v38 = vld [vmem:[#allocation8 + $0x30] sm:$0xff] (%p112_p0) }
 0x3ad   : > { %495 = vst [vmem:[#allocation2 + $0x28] sm:$0xff] %v493_v39  ;;  %422 = vmatmul.bf16.vlgmr.msra.gmra.mxu1 %v412_v37  ;;  %v595_v37 = vld [vmem:[#allocation8 + $0x128] sm:$0xff] (%p112_p0)  ;;  %v535_v39 = vld [vmem:[#allocation8 + $0xa0] sm:$0xff] (%p112_p0) }
 0x3ae   : > { %v406_v40 = vpop.f32.mrf.mxu3 }
 0x3af   :  { %v635_v40 = vld [vmem:[#allocation8 + $0x1a8] sm:$0xff] (%p112_p0) }
 0x42a   : > { %v423_v41 = vpop.f32.mrf.mxu1 }
 0x42b   : > { %v427_v42 = vadd.f32 %v423_v41, %v413_v63  ;;  %v605_v63 = vld [vmem:[#allocation8 + $0x178] sm:$0xff] (%p112_p0)  ;;  %v594_v41 = vld [vmem:[#allocation8 + $0x120] sm:$0xff] (%p112_p0) }
 0x42d   : > { %v428_v43 = vmax.f32 %v427_v42, 0.0  ;;  %v517_v42 = vld [vmem:[#allocation8 + $0x28] sm:$0xff] (%p112_p0) }
 0x42f   : > { %v431_v44 = vpack.c.bf16 %v428_v43, %v428_v43  ;;  %v480_v45 = vsel %vm1205_vm0, %v353_v22, %v428_v43  ;;  %v498_v46 = vsel %vm1205_vm0, %v428_v43, %v353_v22  ;;  %v599_v22 = vld [vmem:[#allocation8 + $0x148] sm:$0xff] (%p112_p0)  ;;  %v534_v43 = vld [vmem:[#allocation8 + $0x98] sm:$0xff] (%p112_p0) }
 0x430   : > { %482 = vst [vmem:[#allocation2 + $0x18] sm:$0xff] %v480_v45  ;;  %v593_v45 = vld [vmem:[#allocation8 + $0x118] sm:$0xff] (%p112_p0) }
 0x431   : > { %500 = vst [vmem:[#allocation2 + $0x40] sm:$0xff] %v498_v46  ;;  %441 = vmatmul.bf16.vlgmr.msra.gmra.mxu2 %v431_v44  ;;  %v634_v44 = vld [vmem:[#allocation8 + $0x1a0] sm:$0xff] (%p112_p0) }
 0x432   : > { %v425_v48 = vpop.f32.mrf.mxu1  ;;  %606 = vmatpush.msra.mxu2 (%p112_p0), %v605_v63  ;;  %v516_v46 = vld [vmem:[#allocation8 + $0x20] sm:$0xff] (%p112_p0)  ;;  %v764_v63 = vld [vmem:[#allocation8 + $0x370] sm:$0xff] (%p112_p0) }
 0x433   :  { %v533_v48 = vld [vmem:[#allocation8 + $0x90] sm:$0xff] (%p112_p0) }
 0x434   :  { %607 = vmatpush.msra.mxu2 (%p112_p0), %v604_v0  ;;  %v805_v0 = vld [vmem:[#allocation8 + $0x3f8] sm:$0xff] (%p112_p0) }
 0x436   :  { %608 = vmatpush.msra.mxu2 (%p112_p0), %v603_v5  ;;  %v763_v5 = vld [vmem:[#allocation8 + $0x368] sm:$0xff] (%p112_p0) }
 0x438   :  { %609 = vmatpush.msra.mxu2 (%p112_p0), %v602_v3  ;;  %v681_v3 = vld [vmem:[#allocation8 + $0x258] sm:$0xff] (%p112_p0) }
 0x43a   :  { %610 = vmatpush.msra.mxu2 (%p112_p0), %v601_v13  ;;  %v680_v13 = vld [vmem:[#allocation8 + $0x250] sm:$0xff] (%p112_p0) }
 0x43c   :  { %611 = vmatpush.msra.mxu2 (%p112_p0), %v600_v17  ;;  %v679_v17 = vld [vmem:[#allocation8 + $0x248] sm:$0xff] (%p112_p0) }
 0x43e   :  { %612 = vmatpush.msra.mxu2 (%p112_p0), %v599_v22  ;;  %v678_v22 = vld [vmem:[#allocation8 + $0x240] sm:$0xff] (%p112_p0) }
 0x440   :  { %613 = vmatpush.msra.mxu2 (%p112_p0), %v598_v25  ;;  %v677_v25 = vld [vmem:[#allocation8 + $0x238] sm:$0xff] (%p112_p0) }
 0x442   :  { %614 = vmatpush.msra.mxu2 (%p112_p0), %v597_v30  ;;  %v676_v30 = vld [vmem:[#allocation8 + $0x230] sm:$0xff] (%p112_p0) }
 0x444   :  { %615 = vmatpush.msra.mxu2 (%p112_p0), %v596_v33  ;;  %v675_v33 = vld [vmem:[#allocation8 + $0x228] sm:$0xff] (%p112_p0) }
 0x446   :  { %616 = vmatpush.msra.mxu2 (%p112_p0), %v595_v37  ;;  %v674_v37 = vld [vmem:[#allocation8 + $0x220] sm:$0xff] (%p112_p0) }
 0x448   :  { %617 = vmatpush.msra.mxu2 (%p112_p0), %v594_v41  ;;  %v673_v41 = vld [vmem:[#allocation8 + $0x218] sm:$0xff] (%p112_p0) }
 0x44a   :  { %618 = vmatpush.msra.mxu2 (%p112_p0), %v593_v45  ;;  %v672_v45 = vld [vmem:[#allocation8 + $0x210] sm:$0xff] (%p112_p0) }
 0x4b4   : > { %v442_v50 = vpop.f32.mrf.mxu2 }
 0x4b5   : > { %v446_v49 = vadd.f32 %v442_v50, %v432_v4  ;;  %v527_v4 = vld [vmem:[#allocation8 + $0x78] sm:$0xff] (%p112_p0) }
 0x4b6   :  { %567 = vmatpush.msra.mxu1 (%p112_p0), %v527_v4  ;;  %v633_v50 = vld [vmem:[#allocation8 + $0x198] sm:$0xff] (%p112_p0) }
 0x4b7   : > { %v447_v51 = vmax.f32 %v446_v49, 0.0  ;;  %v592_v49 = vld [vmem:[#allocation8 + $0x110] sm:$0xff] (%p112_p0)  ;;  %v725_v4 = vld [vmem:[#allocation8 + $0x2f8] sm:$0xff] (%p112_p0) }
 0x4b8   :  { %568 = vmatpush.msra.mxu1 (%p112_p0), %v526_v8  ;;  %619 = vmatpush.msra.mxu2 (%p112_p0), %v592_v49  ;;  %v724_v8 = vld [vmem:[#allocation8 + $0x2f0] sm:$0xff] (%p112_p0)  ;;  %v671_v49 = vld [vmem:[#allocation8 + $0x208] sm:$0xff] (%p112_p0) }
 0x4b9   : > { %v450_v52 = vpack.c.bf16 %v447_v51, %v447_v51  ;;  %v475_v53 = vsel %vm1205_vm0, %v334_v16, %v447_v51  ;;  %v503_v54 = vsel %vm1205_vm0, %v447_v51, %v334_v16  ;;  %v641_v16 = vld [vmem:[#allocation8 + $0x1d8] sm:$0xff] (%p112_p0) }
 0x4ba   : > { %477 = vst [vmem:[#allocation2] sm:$0xff] %v475_v53  ;;  %569 = vmatpush.msra.mxu1 (%p112_p0), %v525_v10  ;;  %v515_v51 = vld [vmem:[#allocation8 + $0x18] sm:$0xff] (%p112_p0)  ;;  %v632_v53 = vld [vmem:[#allocation8 + $0x190] sm:$0xff] (%p112_p0)  ;;  %v803_v10 = vld [vmem:[#allocation8 + $0x3e8] sm:$0xff] (%p112_p0) }
 0x4bb   : > { %505 = vst [vmem:[#allocation2 + $0x38] sm:$0xff] %v503_v54  ;;  %460 = vmatmul.bf16.vlgmr.msra.gmra.mxu3 %v450_v52  ;;  %v532_v52 = vld [vmem:[#allocation8 + $0x88] sm:$0xff] (%p112_p0) }
 0x4bc   : > { %v444_v55 = vpop.f32.mrf.mxu2  ;;  %646 = vmatpush.msra.mxu3 (%p112_p0), %v645_v2  ;;  %570 = vmatpush.msra.mxu1 (%p112_p0), %v524_v14  ;;  %v591_v54 = vld [vmem:[#allocation8 + $0x108] sm:$0xff] (%p112_p0)  ;;  %v512_v2 = vld [vmem:[#allocation8] sm:$0xff] (%p112_p0) }
 0x4bd   :  { %v514_v55 = vld [vmem:[#allocation8 + $0x10] sm:$0xff] (%p112_p0)  ;;  %620 = vmatpush.msra.mxu2 (%p112_p0), %v591_v54  ;;  %v802_v14 = vld [vmem:[#allocation8 + $0x3e0] sm:$0xff] (%p112_p0) }
 0x4be   :  { %647 = vmatpush.msra.mxu3 (%p112_p0), %v644_v6  ;;  %571 = vmatpush.msra.mxu1 (%p112_p0), %v523_v19  ;;  %v682_v6 = vld [vmem:[#allocation8 + $0x260] sm:$0xff] (%p112_p0)  ;;  %v801_v19 = vld [vmem:[#allocation8 + $0x3d8] sm:$0xff] (%p112_p0) }
 0x4bf   :  { %v670_v54 = vld [vmem:[#allocation8 + $0x200] sm:$0xff] (%p112_p0) }
 0x4c0   :  { %572 = vmatpush.msra.mxu1 (%p112_p0), %v522_v23  ;;  %v800_v23 = vld [vmem:[#allocation8 + $0x3d0] sm:$0xff] (%p112_p0) }
 0x4c2   :  { %573 = vmatpush.msra.mxu1 (%p112_p0), %v521_v29  ;;  %v799_v29 = vld [vmem:[#allocation8 + $0x3c8] sm:$0xff] (%p112_p0) }
 0x4c4   :  { %574 = vmatpush.msra.mxu1 (%p112_p0), %v520_v28  ;;  %v798_v28 = vld [vmem:[#allocation8 + $0x3c0] sm:$0xff] (%p112_p0) }
 0x4c6   :  { %575 = vmatpush.msra.mxu1 (%p112_p0), %v519_v34  ;;  %v797_v34 = vld [vmem:[#allocation8 + $0x3b8] sm:$0xff] (%p112_p0) }
 0x4c8   :  { %576 = vmatpush.msra.mxu1 (%p112_p0), %v518_v38  ;;  %v796_v38 = vld [vmem:[#allocation8 + $0x3b0] sm:$0xff] (%p112_p0) }
 0x4ca   :  { %577 = vmatpush.msra.mxu1 (%p112_p0), %v517_v42  ;;  %v795_v42 = vld [vmem:[#allocation8 + $0x3a8] sm:$0xff] (%p112_p0) }
 0x4cc   :  { %578 = vmatpush.msra.mxu1 (%p112_p0), %v516_v46  ;;  %v753_v46 = vld [vmem:[#allocation8 + $0x318] sm:$0xff] (%p112_p0) }
 0x4ce   :  { %579 = vmatpush.msra.mxu1 (%p112_p0), %v515_v51  ;;  %v628_v51 = vld [vmem:[#allocation2 + $0x10] sm:$0xff] (%p112_p0) }
 0x4d0   :  { %580 = vmatpush.msra.mxu1 (%p112_p0), %v514_v55  ;;  %v793_v55 = vld [vmem:[#allocation8 + $0x398] sm:$0xff] (%p112_p0) }
 0x53e   : > { %v461_v56 = vpop.f32.mrf.mxu3 }
 0x53f   : > { %v465_v47 = vadd.f32 %v461_v56, %v451_v9  ;;  %v643_v9 = vld [vmem:[#allocation8 + $0x1e8] sm:$0xff] (%p112_p0)  ;;  %v531_v56 = vld [vmem:[#allocation8 + $0x80] sm:$0xff] (%p112_p0) }
 0x540   :  { %648 = vmatpush.msra.mxu3 (%p112_p0), %v643_v9  ;;  %v762_v9 = vld [vmem:[#allocation8 + $0x360] sm:$0xff] (%p112_p0) }
 0x541   : > { %v466_v57 = vmax.f32 %v465_v47, 0.0  ;;  %v631_v47 = vld [vmem:[#allocation8 + $0x188] sm:$0xff] (%p112_p0) }
 0x542   :  { %114 = sbr.rel (!%p112_p0) target bundleno = 24 (0x18), region = 106  ;;  %649 = vmatpush.msra.mxu3 (%p112_p0), %v642_v12  ;;  %v761_v12 = vld [vmem:[#allocation8 + $0x358] sm:$0xff] (%p112_p0) }
 0x543   : > { %v471_v58 = vsel %vm1205_vm0, %v1381_v11, %v466_v57  ;;  %v508_v59 = vsel %vm1205_vm0, %v466_v57, %v1381_v11  ;;  %v542_v11 = vld [vmem:[#allocation8 + $0xd8] sm:$0xff] (%p112_p0) }
 0x544   : > { %472 = vst [vmem:[#allocation2 + $0x30] sm:$0xff] %v471_v58  ;;  %551 = vmatpush.msra.mxu0 (%p112_p0), %v542_v11  ;;  %650 = vmatpush.msra.mxu3 (%p112_p0), %v641_v16  ;;  %v685_v57 = vld [vmem:[#allocation8 + $0x278] sm:$0xff] (%p112_p0)  ;;  %v590_v58 = vld [vmem:[#allocation8 + $0x100] sm:$0xff] (%p112_p0)  ;;  %v723_v11 = vld [vmem:[#allocation8 + $0x2e8] sm:$0xff] (%p112_p0) }
 0x545   : > { %510 = vst [vmem:[#allocation2 + $0x8] sm:$0xff] %v508_v59  ;;  %v765_v59 = vld [vmem:[#allocation8 + $0x378] sm:$0xff] (%p112_p0)  ;;  %621 = vmatpush.msra.mxu2 (%p112_p0), %v590_v58  ;;  %v760_v16 = vld [vmem:[#allocation8 + $0x350] sm:$0xff] (%p112_p0)  ;;  %v751_v58 = vld [vmem:[#allocation8 + $0x308] sm:$0xff] (%p112_p0) }
 0x546   : > { %v463_v60 = vpop.f32.mrf.mxu3  ;;  %552 = vmatpush.msra.mxu0 (%p112_p0), %v541_v15  ;;  %651 = vmatpush.msra.mxu3 (%p112_p0), %v640_v21  ;;  %v722_v15 = vld [vmem:[#allocation8 + $0x2e0] sm:$0xff] (%p112_p0)  ;;  %v759_v21 = vld [vmem:[#allocation8 + $0x348] sm:$0xff] (%p112_p0) }
 0x547   :  { %v513_v60 = vld [vmem:[#allocation8 + $0x8] sm:$0xff]  ;;  %766 = vmatpush.msrb.mxu2 %v765_v59  ;;  %v792_v59 = vld [vmem:[#allocation8 + $0x390] sm:$0xff] }
 0x548   :  { %553 = vmatpush.msra.mxu0 %v540_v20  ;;  %652 = vmatpush.msra.mxu3 %v639_v24  ;;  %v721_v20 = vld [vmem:[#allocation8 + $0x2d8] sm:$0xff]  ;;  %v758_v24 = vld [vmem:[#allocation8 + $0x340] sm:$0xff] }
 0x549   :  { %581 = vmatpush.msra.mxu1 %v513_v60  ;;  %767 = vmatpush.msrb.mxu2 %v764_v63  ;;  %v844_v60 = vld [vmem:[#allocation8 + $0x470] sm:$0xff]  ;;  %v791_v63 = vld [vmem:[#allocation8 + $0x388] sm:$0xff] }
 0x54a   :  { %554 = vmatpush.msra.mxu0 %v539_v18  ;;  %653 = vmatpush.msra.mxu3 %v638_v27  ;;  %v720_v18 = vld [vmem:[#allocation8 + $0x2d0] sm:$0xff]  ;;  %v757_v27 = vld [vmem:[#allocation8 + $0x338] sm:$0xff] }
 0x54b   :  { %582 = vmatpush.msra.mxu1 %v512_v2  ;;  %768 = vmatpush.msrb.mxu2 %v763_v5  ;;  %v711_v2 = vld [vmem:[#allocation8 + $0x288] sm:$0xff]  ;;  %v668_v5 = vld [vmem:[#allocation2 + $0x20] sm:$0xff] }
 0x54c   :  { %555 = vmatpush.msra.mxu0 %v538_v26  ;;  %654 = vmatpush.msra.mxu3 %v637_v32  ;;  %v719_v26 = vld [vmem:[#allocation8 + $0x2c8] sm:$0xff]  ;;  %v756_v32 = vld [vmem:[#allocation8 + $0x330] sm:$0xff] }
 0x54d   :  { %726 = vmatpush.msrb.mxu1 %v725_v4  ;;  %769 = vmatpush.msrb.mxu2 %v762_v9  ;;  %v790_v4 = vld [vmem:[#allocation8 + $0x380] sm:$0xff] }
 0x54e   :  { %556 = vmatpush.msra.mxu0 %v537_v31  ;;  %655 = vmatpush.msra.mxu3 %v636_v36  ;;  %v718_v31 = vld [vmem:[#allocation8 + $0x2c0] sm:$0xff]  ;;  %v755_v36 = vld [vmem:[#allocation8 + $0x328] sm:$0xff] }
 0x54f   :  { %727 = vmatpush.msrb.mxu1 %v724_v8  ;;  %770 = vmatpush.msrb.mxu2 %v761_v12  ;;  %v710_v8 = vld [vmem:[#allocation8 + $0x280] sm:$0xff] }
 0x550   :  { %557 = vmatpush.msra.mxu0 %v536_v35  ;;  %656 = vmatpush.msra.mxu3 %v635_v40  ;;  %v717_v35 = vld [vmem:[#allocation8 + $0x2b8] sm:$0xff]  ;;  %v754_v40 = vld [vmem:[#allocation8 + $0x320] sm:$0xff] }
 0x551   :  { %728 = vmatpush.msrb.mxu1 %v723_v11  ;;  %771 = vmatpush.msrb.mxu2 %v760_v16  ;;  %v708_v9 = vld [vmem:[#allocation2 + $0x28] sm:$0xff]  ;;  %v839_v11 = vld [vmem:[#allocation8 + $0x448] sm:$0xff] }
 0x552   :  { %558 = vmatpush.msra.mxu0 %v535_v39  ;;  %657 = vmatpush.msra.mxu3 %v634_v44  ;;  %v716_v39 = vld [vmem:[#allocation8 + $0x2b0] sm:$0xff]  ;;  %v715_v44 = vld [vmem:[#allocation8 + $0x2a8] sm:$0xff]  ;;  %v838_v12 = vld [vmem:[#allocation8 + $0x440] sm:$0xff] }
 0x553   :  { %729 = vmatpush.msrb.mxu1 %v722_v15  ;;  %772 = vmatpush.msrb.mxu2 %v759_v21  ;;  %v835_v15 = vld [vmem:[#allocation8 + $0x428] sm:$0xff]  ;;  %v834_v16 = vld [vmem:[#allocation8 + $0x420] sm:$0xff] }
 0x554   :  { %559 = vmatpush.msra.mxu0 %v534_v43  ;;  %658 = vmatpush.msra.mxu3 %v633_v50  ;;  %v588_v43 = vld [vmem:[#allocation2 + $0x18] sm:$0xff]  ;;  %v529_v50 = vld [vmem:[#allocation2] sm:$0xff]  ;;  %v830_v21 = vld [vmem:[#allocation8 + $0x400] sm:$0xff] }
 0x555   :  { %730 = vmatpush.msrb.mxu1 %v721_v20  ;;  %773 = vmatpush.msrb.mxu2 %v758_v24  ;;  %v831_v20 = vld [vmem:[#allocation8 + $0x408] sm:$0xff]  ;;  %v886_v24 = vld [vmem:[%s1500_s6 + $0x68] sm:$0xff] }
 0x556   :  { %560 = vmatpush.msra.mxu0 %v533_v48  ;;  %659 = vmatpush.msra.mxu3 %v632_v53  ;;  %v794_v48 = vld [vmem:[#allocation8 + $0x3a0] sm:$0xff]  ;;  %v752_v53 = vld [vmem:[#allocation8 + $0x310] sm:$0xff] }
 0x557   :  { %731 = vmatpush.msrb.mxu1 %v720_v18  ;;  %774 = vmatpush.msrb.mxu2 %v757_v27  ;;  %v887_v18 = vld [vmem:[%s1500_s6 + $0x70] sm:$0xff]  ;;  %v882_v27 = vld [vmem:[%s1500_s6 + $0x48] sm:$0xff] }
 0x558   :  { %561 = vmatpush.msra.mxu0 %v532_v52  ;;  %660 = vmatpush.msra.mxu3 %v631_v47  ;;  %v714_v52 = vld [vmem:[#allocation8 + $0x2a0] sm:$0xff]  ;;  %v845_v47 = vld [vmem:[#allocation8 + $0x478] sm:$0xff] }
 0x559   :  { %732 = vmatpush.msrb.mxu1 %v719_v26  ;;  %775 = vmatpush.msrb.mxu2 %v756_v32  ;;  %v883_v26 = vld [vmem:[%s1500_s6 + $0x50] sm:$0xff]  ;;  %v878_v32 = vld [vmem:[%s1500_s6 + $0x28] sm:$0xff] }
 0x55a   :  { %562 = vmatpush.msra.mxu0 %v531_v56  ;;  %661 = vmatpush.msra.mxu3 %v630_v62  ;;  %v511_v56 = vld [vmem:[#allocation2 + $0x30] sm:$0xff]  ;;  %v750_v62 = vld [vmem:[#allocation8 + $0x300] sm:$0xff] }
 0x55b   :  { %733 = vmatpush.msrb.mxu1 %v718_v31  ;;  %776 = vmatpush.msrb.mxu2 %v755_v36  ;;  %v879_v31 = vld [vmem:[%s1500_s6 + $0x30] sm:$0xff]  ;;  %v874_v36 = vld [vmem:[%s1500_s6 + $0x8] sm:$0xff] }
 0x55c   :  { %686 = vmatpush.msrb.mxu0 %v685_v57  ;;  %806 = vmatpush.msrb.mxu3 %v805_v0  ;;  %v713_v57 = vld [vmem:[#allocation8 + $0x298] sm:$0xff] }
 0x55d   :  { %734 = vmatpush.msrb.mxu1 %v717_v35  ;;  %777 = vmatpush.msrb.mxu2 %v754_v40  ;;  %v748_v0 = vld [vmem:[#allocation2 + $0x40] sm:$0xff]  ;;  %v875_v35 = vld [vmem:[%s1500_s6 + $0x10] sm:$0xff] }
 0x55e   :  { %687 = vmatpush.msrb.mxu0 %v684_v61  ;;  %807 = vmatpush.msrb.mxu3 %v804_v7  ;;  %v712_v61 = vld [vmem:[#allocation8 + $0x290] sm:$0xff]  ;;  %v842_v7 = vld [vmem:[#allocation8 + $0x460] sm:$0xff] }
 0x55f   :  { %735 = vmatpush.msrb.mxu1 %v716_v39  ;;  %622 = vmatmul.f32.vlgmr.msra.gmra.mxu2 %v588_v43 }
 0x560   :  { %688 = vmatpush.msrb.mxu0 %v683_v1  ;;  %808 = vmatpush.msrb.mxu3 %v803_v10  ;;  %v843_v1 = vld [vmem:[#allocation8 + $0x468] sm:$0xff]  ;;  %v840_v10 = vld [vmem:[#allocation8 + $0x450] sm:$0xff] }
 0x561   :  { %736 = vmatpush.msrb.mxu1 %v715_v44  ;;  %778 = vmatpush.msrb.mxu2 %v753_v46 }
 0x562   :  { %689 = vmatpush.msrb.mxu0 %v682_v6  ;;  %809 = vmatpush.msrb.mxu3 %v802_v14  ;;  %v788_v6 = vld [vmem:[#allocation2 + $0x38] sm:$0xff] }
 0x563   :  { %563 = vmatmul.f32.vlgmr.msra.gmra.mxu0 %v529_v50  ;;  %662 = vmatmul.f32.vlgmr.msra.gmra.mxu3 %v628_v51  ;;  %v836_v14 = vld [vmem:[#allocation8 + $0x430] sm:$0xff] }
 0x564   :  { %690 = vmatpush.msrb.mxu0 %v681_v3  ;;  %810 = vmatpush.msrb.mxu3 %v801_v19  ;;  %v841_v3 = vld [vmem:[#allocation8 + $0x458] sm:$0xff]  ;;  %v832_v19 = vld [vmem:[#allocation8 + $0x410] sm:$0xff] }
 0x565   :  { %737 = vmatpush.msrb.mxu1 %v714_v52  ;;  %779 = vmatpush.msrb.mxu2 %v752_v53 }
 0x566   :  { %691 = vmatpush.msrb.mxu0 %v680_v13  ;;  %811 = vmatpush.msrb.mxu3 %v800_v23  ;;  %v837_v13 = vld [vmem:[#allocation8 + $0x438] sm:$0xff]  ;;  %v888_v23 = vld [vmem:[%s1500_s6 + $0x78] sm:$0xff] }
 0x567   :  { %583 = vmatmul.f32.vlgmr.msra.gmra.mxu1 %v511_v56  ;;  %780 = vmatpush.msrb.mxu2 %v751_v58  ;;  %v1054_v58 = vld [vmem:[%s1501_s7] ss:$0 sm:$0xff] }
 0x568   :  { %692 = vmatpush.msrb.mxu0 %v679_v17  ;;  %812 = vmatpush.msrb.mxu3 %v799_v29  ;;  %v833_v17 = vld [vmem:[#allocation8 + $0x418] sm:$0xff]  ;;  %v884_v29 = vld [vmem:[%s1500_s6 + $0x58] sm:$0xff] }
 0x569   :  { %738 = vmatpush.msrb.mxu1 %v713_v57  ;;  %781 = vmatpush.msrb.mxu2 %v750_v62 }
 0x56a   :  { %693 = vmatpush.msrb.mxu0 %v678_v22  ;;  %813 = vmatpush.msrb.mxu3 %v798_v28  ;;  %v828_v22 = vld [vmem:[#allocation2 + $0x8] sm:$0xff]  ;;  %v880_v28 = vld [vmem:[%s1500_s6 + $0x38] sm:$0xff] }
 0x56b   :  { %739 = vmatpush.msrb.mxu1 %v712_v61  ;;  %782 = vmatmul.f32.vlgmr.msrb.gmra.mxu2 %v748_v0 }
 0x56c   :  { %694 = vmatpush.msrb.mxu0 %v677_v25  ;;  %814 = vmatpush.msrb.mxu3 %v797_v34  ;;  %v885_v25 = vld [vmem:[%s1500_s6 + $0x60] sm:$0xff]  ;;  %v876_v34 = vld [vmem:[%s1500_s6 + $0x18] sm:$0xff] }
 0x56d   :  { %740 = vmatpush.msrb.mxu1 %v711_v2 }
 0x56e   :  { %695 = vmatpush.msrb.mxu0 %v676_v30  ;;  %815 = vmatpush.msrb.mxu3 %v796_v38  ;;  %v881_v30 = vld [vmem:[%s1500_s6 + $0x40] sm:$0xff] }
 0x56f   :  { %741 = vmatpush.msrb.mxu1 %v710_v8  ;;  %v873_v38 = vld [vmem:[%s1500_s6] sm:$0xff] }
 0x570   :  { %696 = vmatpush.msrb.mxu0 %v675_v33  ;;  %816 = vmatpush.msrb.mxu3 %v795_v42  ;;  %v877_v33 = vld [vmem:[%s1500_s6 + $0x20] sm:$0xff] }
 0x571   :  { %742 = vmatmul.f32.vlgmr.msrb.gmra.mxu1 %v708_v9 }
 0x572   :  { %697 = vmatpush.msrb.mxu0 %v674_v37  ;;  %817 = vmatpush.msrb.mxu3 %v794_v48 }
 0x573   :  { %893 = vmatpush.msra.mxu1 %v888_v23 }
 0x574   :  { %698 = vmatpush.msrb.mxu0 %v673_v41  ;;  %818 = vmatpush.msrb.mxu3 %v793_v55 }
 0x575   :  { %894 = vmatpush.msra.mxu1 %v887_v18 }
 0x576   :  { %699 = vmatpush.msrb.mxu0 %v672_v45  ;;  %819 = vmatpush.msrb.mxu3 %v792_v59 }
 0x577   :  { %895 = vmatpush.msra.mxu1 %v886_v24 }
 0x578   :  { %700 = vmatpush.msrb.mxu0 %v671_v49  ;;  %820 = vmatpush.msrb.mxu3 %v791_v63 }
 0x579   :  { %896 = vmatpush.msra.mxu1 %v885_v25 }
 0x57a   :  { %701 = vmatpush.msrb.mxu0 %v670_v54  ;;  %821 = vmatpush.msrb.mxu3 %v790_v4  ;;  %v1053_v54 = vld [vmem:[%s1499_s5] ss:$0 sm:$0xff] }
 0x57b   :  { %702 = vmatmul.f32.vlgmr.msrb.gmra.mxu0 %v668_v5  ;;  %822 = vmatmul.f32.vlgmr.msrb.gmra.mxu3 %v788_v6 }
 0x57c   :  { %846 = vmatpush.msra.mxu0 %v845_v47  ;;  %897 = vmatpush.msra.mxu1 %v884_v29 }
 0x57e   :  { %847 = vmatpush.msra.mxu0 %v844_v60  ;;  %898 = vmatpush.msra.mxu1 %v883_v26 }
 0x580   :  { %848 = vmatpush.msra.mxu0 %v843_v1  ;;  %899 = vmatpush.msra.mxu1 %v882_v27 }
 0x582   :  { %849 = vmatpush.msra.mxu0 %v842_v7  ;;  %900 = vmatpush.msra.mxu1 %v881_v30 }
 0x584   :  { %850 = vmatpush.msra.mxu0 %v841_v3  ;;  %901 = vmatpush.msra.mxu1 %v880_v28 }
 0x586   :  { %851 = vmatpush.msra.mxu0 %v840_v10  ;;  %902 = vmatpush.msra.mxu1 %v879_v31 }
 0x588   :  { %852 = vmatpush.msra.mxu0 %v839_v11  ;;  %903 = vmatpush.msra.mxu1 %v878_v32 }
 0x58a   :  { %853 = vmatpush.msra.mxu0 %v838_v12  ;;  %904 = vmatpush.msra.mxu1 %v877_v33 }
 0x58c   :  { %854 = vmatpush.msra.mxu0 %v837_v13  ;;  %905 = vmatpush.msra.mxu1 %v876_v34 }
 0x58e   :  { %855 = vmatpush.msra.mxu0 %v836_v14  ;;  %906 = vmatpush.msra.mxu1 %v875_v35 }
 0x590   :  { %856 = vmatpush.msra.mxu0 %v835_v15  ;;  %907 = vmatpush.msra.mxu1 %v874_v36 }
 0x592   :  { %857 = vmatpush.msra.mxu0 %v834_v16  ;;  %908 = vmatpush.msra.mxu1 %v873_v38 }
 0x594   :  { %858 = vmatpush.msra.mxu0 %v833_v17 }
 0x596   :  { %859 = vmatpush.msra.mxu0 %v832_v19 }
 0x598   :  { %860 = vmatpush.msra.mxu0 %v831_v20 }
 0x59a   :  { %861 = vmatpush.msra.mxu0 %v830_v21 }
 0x59b   :  { %862 = vmatmul.f32.vlgmr.msra.gmra.mxu0 %v828_v22 }
 0x5e0   :  { %v564_v39 = vpop.f32.mrf.mxu0 }
 0x5e2   :  { %v623_v41 = vpop.f32.mrf.mxu2 }
 0x5e4   :  { %v584_v37 = vpop.f32.mrf.mxu1 }
 0x5e5   :  { %v585_v40 = vadd.f32 %v584_v37, %v564_v39 }
 0x5e6   :  { %v663_v43 = vpop.f32.mrf.mxu3 }
 0x5e7   :  { %v626_v42 = vadd.f32 %v623_v41, %v585_v40 }
 0x5e9   :  { %v666_v44 = vadd.f32 %v663_v43, %v626_v42 }
 0x5ee   :  { %v743_v48 = vpop.f32.mrf.mxu1  ;;  %v783_v49 = vpop.f32.mrf.mxu2 }
 0x5f8   :  { %v703_v45 = vpop.f32.mrf.mxu0 }
 0x5f9   :  { %v706_v46 = vadd.f32 %v703_v45, %v666_v44 }
 0x5fb   :  { %v746_v50 = vadd.f32 %v743_v48, %v706_v46 }
 0x5fd   :  { %v786_v51 = vadd.f32 %v783_v49, %v746_v50 }
 0x5fe   :  { %v823_v52 = vpop.f32.mrf.mxu3 }
 0x5ff   :  { %v826_v53 = vadd.f32 %v823_v52, %v786_v51 }
 0x618   :  { %v863_v55 = vpop.f32.mrf.mxu0 }
 0x619   :  { %v866_v56 = vadd.f32 %v863_v55, %v826_v53 }
 0x61b   :  { %v871_v47 = vadd.f32 %v1053_v54, %v866_v56 }
 0x61d   :  { %v872_v57 = vmax.f32 %v871_v47, 0.0 }
 0x61f   :  { %909 = vmatmul.f32.vlgmr.msra.gmra.mxu1 %v872_v57 }
 0x69c   :  { %v910_v59 = vpop.f32.mrf.mxu1 }
 0x69d   :  { %v911_v60 = vadd.f32 %v1054_v58, %v910_v59 }
 0x69f   :  { %v1017_v61 = vmul.f32 -1.442695, %v911_v60 }
 0x6a1   :  { %1055 = vpow2.f32 %v1017_v61 }
 0x6a7   :  { %v1056_v62 = vpop.eup %1055 }
 0x6a8   :  { %v916_v63 = vadd.f32 1.0, %v1056_v62 }
 0x6aa   :  { %1057 = vrcp.f32 %v916_v63  ;;  %v928_v4 = vand.u32 2147483648, %v916_v63  ;;  %v926_v6 = vand.u32 2147483647, %v916_v63  ;;  %vm922_vm2 = vweird.f32 %v916_v63 }
 0x6ac   :  { %v929_v8 = vor.u32 1.1754944e-38, %v928_v4  ;;  %vm927_vm5 = vcmp.eq.f32.partialorder %v926_v6, 8.507059e+37 }
 0x6b0   :  { %v1058_v0 = vpop.eup %1057 }
 0x6b1   :  { %v918_v1 = vmul.f32 %v1058_v0, %v916_v63  ;;  %vm923_vm1 = vweird.f32 %v1058_v0 }
 0x6b2   :  { %vm924_vm3 = vmor %vm922_vm2, %vm923_vm1 }
 0x6b3   :  { %v919_v2 = vsub.f32 1.0, %v918_v1 }
 0x6b5   :  { %v920_v5 = vmul.f32 %v1058_v0, %v919_v2 }
 0x6b7   :  { %v921_v7 = vadd.f32 %v1058_v0, %v920_v5 }
 0x6b9   :  { %v925_v9 = vsel %vm924_vm3, %v1058_v0, %v921_v7 }
 0x6ba   :  { %v930_v3 = vsel %vm927_vm5, %v929_v8, %v925_v9 }
 0x6bb   :  { %933 = vst.msk [vmem:[%s1502_s8] sm:$0xff] %vm932_vm4, %v930_v3 }
 0x6bc   :  { %938 = vsyncpa [#allocation5], 1 }
 0x6bd   :  { %939 = vsyncpa [#allocation7], 1 }

</bundles_post_ra>
